<compile_context>
chip_gen: v7x
topology: tpu7x:2x2x1
jax: 0.10.0
libtpu: 0.0.40
codegen_flags: <defaults>
</compile_context>

<pallas_src>
import numpy as np

import jax
import jax.numpy as jnp
from jax import lax
from jax.experimental import pallas as pl
from jax.experimental.pallas import tpu as pltpu

# ----- PWLToneMapping constants (from the module __init__) -----
N_BREAKPOINTS = 30
B_LEFT = 0.0
B_RIGHT = 1.0
INTERVAL = (B_RIGHT - B_LEFT) / N_BREAKPOINTS
INV_INTERVAL = N_BREAKPOINTS / (B_RIGHT - B_LEFT)

LANE = 128              # lane width of the 2D view (native per-vreg gather width)
SUBLANE = 8             # rows per vreg / per gather stripe
MAX_BLOCK_ROWS = 1024   # (1024, 128) f32 block = 0.5 MiB (in + out double-buffered ~2 MiB)


# --------------------------------------------------------------------------
# Kernels
# --------------------------------------------------------------------------
def _pwl_gather_kernel(tbl_ref, x_ref, o_ref):
    """Fast path: per-vreg lane gather of (slope_k, y_k).

    tbl_ref : VMEM (16, 128) f32; rows 0..7 each hold slope_k in lane k,
              rows 8..15 each hold y_k (left breakpoint value) in lane k.
    x_ref   : VMEM (br, 128) input block (any float dtype; cast in-register)
    o_ref   : VMEM (br, 128) f32 output block
    """
    slope_tab = tbl_ref[0:SUBLANE, :]        # one vreg, reused for every stripe
    y_tab = tbl_ref[SUBLANE:2 * SUBLANE, :]  # one vreg
    n_stripes = x_ref.shape[0] // SUBLANE

    def stripe(s, carry):
        r = pl.multiple_of(s * SUBLANE, SUBLANE)
        x = x_ref[pl.ds(r, SUBLANE), :].astype(jnp.float32)
        # trunc == floor for x >= b_left; for x < b_left both land below 0 and the
        # int clip pins the index to 0 (also keeps ragged-block garbage in-bounds).
        idx = jnp.clip(((x - B_LEFT) * INV_INTERVAL).astype(jnp.int32),
                       0, N_BREAKPOINTS - 1)
        slope = jnp.take_along_axis(slope_tab, idx, axis=1, mode="clip")
        yl = jnp.take_along_axis(y_tab, idx, axis=1, mode="clip")
        xl = B_LEFT + idx.astype(jnp.float32) * INTERVAL
        o_ref[pl.ds(r, SUBLANE), :] = jnp.clip((x - xl) * slope + yl, 0.0, 1.0)
        return carry

    lax.fori_loop(0, n_stripes, stripe, 0, unroll=8)


def _pwl_select_kernel(tbl_ref, x_ref, o_ref):
    """Emergency fallback (known-good lowering): unrolled compare/select LUT.

    tbl_ref : SMEM (16, 128) f32; row 0 = slope_k, row 8 = y_k.
    """
    x = x_ref[...].astype(jnp.float32)
    idx = jnp.clip(((x - B_LEFT) * INV_INTERVAL).astype(jnp.int32),
                   0, N_BREAKPOINTS - 1)
    slope = jnp.zeros_like(x)
    yl = jnp.zeros_like(x)
    for k in range(N_BREAKPOINTS):
        m = idx == k
        slope = jnp.where(m, tbl_ref[0, k], slope)
        yl = jnp.where(m, tbl_ref[SUBLANE, k], yl)
    xl = B_LEFT + idx.astype(jnp.float32) * INTERVAL
    o_ref[...] = jnp.clip((x - xl) * slope + yl, 0.0, 1.0)


# --------------------------------------------------------------------------
# Wrapper
# --------------------------------------------------------------------------
def _build_table(y_pos):
    """Pack per-segment slope (rows 0-7) and left-y (rows 8-15) into (16,128)."""
    y = y_pos.astype(jnp.float32)
    slope = (y[1:] - y[:-1]) * jnp.float32(INV_INTERVAL)      # (30,)
    row_s = jnp.zeros((LANE,), jnp.float32).at[:N_BREAKPOINTS].set(slope)
    row_y = jnp.zeros((LANE,), jnp.float32).at[:N_BREAKPOINTS].set(y[:N_BREAKPOINTS])
    return jnp.concatenate(
        [jnp.broadcast_to(row_s, (SUBLANE, LANE)),
         jnp.broadcast_to(row_y, (SUBLANE, LANE))], axis=0)


def _tone_map_call(x2d, tbl, *, use_gather):
    rows = x2d.shape[0]
    br = min(rows, MAX_BLOCK_ROWS)
    grid = (pl.cdiv(rows, br),)
    n = rows * LANE

    if use_gather:
        kernel = _pwl_gather_kernel
        tbl_spec = pl.BlockSpec((2 * SUBLANE, LANE), lambda i: (0, 0))  # VMEM LUT
    else:
        kernel = _pwl_select_kernel
        tbl_spec = pl.BlockSpec(memory_space=pltpu.MemorySpace.SMEM)

    return pl.pallas_call(
        kernel,
        out_shape=jax.ShapeDtypeStruct((rows, LANE), jnp.float32),
        grid=grid,
        in_specs=[
            tbl_spec,
            pl.BlockSpec((br, LANE), lambda i: (i, 0)),
        ],
        out_specs=pl.BlockSpec((br, LANE), lambda i: (i, 0)),
        compiler_params=pltpu.CompilerParams(
            dimension_semantics=("parallel",),
        ),
        cost_estimate=pl.CostEstimate(
            flops=10 * n,
            transcendentals=0,
            bytes_accessed=n * x2d.dtype.itemsize + n * 4,
        ),
    )(tbl, x2d)


# Static, once-only capability probe (not on the hot path, no host sync per call).
_GATHER_SUPPORTED = None


def _gather_supported():
    global _GATHER_SUPPORTED
    if _GATHER_SUPPORTED is None:
        try:
            x2d = jax.ShapeDtypeStruct((MAX_BLOCK_ROWS, LANE), jnp.float32)
            tbl = jax.ShapeDtypeStruct((2 * SUBLANE, LANE), jnp.float32)
            jax.jit(
                lambda a, t: _tone_map_call(a, t, use_gather=True)
            ).lower(x2d, tbl).compile()
            _GATHER_SUPPORTED = True
        except Exception:
            _GATHER_SUPPORTED = False
    return _GATHER_SUPPORTED


def pwl_tone_map(image, y_pos):
    """Apply PWL tone-mapping to an NCHW image via the Pallas kernel."""
    shape = image.shape
    total = int(np.prod(shape))
    use_gather = _gather_supported()        # static decision; jit-friendly below
    tbl = _build_table(y_pos)

    flat = image.reshape(-1)                # dtype cast happens inside the kernel
    pad = (-total) % (SUBLANE * LANE)
    if pad:
        flat = jnp.pad(flat, (0, pad))
    x2d = flat.reshape(-1, LANE)

    out2d = _tone_map_call(x2d, tbl, use_gather=use_gather)

    out_flat = out2d.reshape(-1)
    if pad:
        out_flat = out_flat[:total]
    return out_flat.reshape(shape)


def gamma_det_forward(image, y_pos, target=None):
    """GammaDet.forward: tone-map image, then (frozen) detector."""
    tm_out = pwl_tone_map(image, y_pos)
    tm_image = [tm_out]  # PWLToneMapping.forward returns a list
    # TODO(synk): FasterRCNN(resnet50-FPN) detector loads an external .pth
    # checkpoint and has no Pallas translation here; returning placeholders.
    losses, detections = None, None
    return losses, detections, tm_image


def pwl_tone_map_ref(image, y_pos):
    """Pure-JAX reference implementing the PyTorch spec exactly."""
    x = image.astype(jnp.float32)
    seg = jnp.floor((x - B_LEFT) / INTERVAL)
    idx = jnp.clip(seg, 0, N_BREAKPOINTS - 1).astype(jnp.int32)
    xl = B_LEFT + idx.astype(jnp.float32) * INTERVAL
    yl = y_pos[idx]
    yr = y_pos[idx + 1]
    slope = (yr - yl) / INTERVAL
    return jnp.clip((x - xl) * slope + yl, 0.0, 1.0)


if __name__ == "__main__":
    key = jax.random.PRNGKey(0)
    k_img1, k_img2, k_y = jax.random.split(key, 3)

    # Non-uniform (but monotone) learnable y_pos so table lookups are genuinely
    # exercised.  (Module init would be linspace(0, 1, 31).)
    y_pos = jnp.sort(jax.random.uniform(k_y, (N_BREAKPOINTS + 1,), dtype=jnp.float32))

    # Small NCHW image: single block (48 rows x 128 lanes).
    image_small = jax.random.uniform(k_img1, (2, 3, 32, 32), dtype=jnp.float32)
    # Moderate image: 2-block grid with a ragged (masked) last block, values
    # outside [0, 1] to exercise the index / output clipping.
    image_med = jax.random.uniform(k_img2, (1, 3, 256, 256), dtype=jnp.float32) * 1.2 - 0.1

    for image in (image_small, image_med):
        losses, detections, tm_image = gamma_det_forward(image, y_pos)
        out = jax.block_until_ready(tm_image[0])
        ref = jax.block_until_ready(pwl_tone_map_ref(image, y_pos))
        np.testing.assert_allclose(
            np.asarray(out), np.asarray(ref), rtol=1e-5, atol=1e-5
        )

    print("KERNEL_OK")
</pallas_src>

<mosaic_0001>
module attributes {stable_mosaic.version = 11 : i64} {
  func.func @_pwl_select_kernel(%arg0: i32, %arg1: memref<16x128xf32, #tpu.memory_space<smem>>, %arg2: memref<48x128xf32, #tpu.memory_space<vmem>>, %arg3: memref<48x128xf32, #tpu.memory_space<vmem>>) attributes {dimension_semantics = [#tpu.dimension_semantics<parallel>], iteration_bounds = array<i64: 1>, scalar_prefetch = 0 : i64, scratch_operands = 0 : i64, tpu.core_type = #tpu.core_type<tc>, window_params = [{transform_indices = @transform_0, window_bounds = array<i64: 16, 128>}, {transform_indices = @transform_1, window_bounds = array<i64: 48, 128>}, {transform_indices = @transform_2, window_bounds = array<i64: 48, 128>}]} {
    %c0 = arith.constant 0 : index
    %c0_0 = arith.constant 0 : index
    %0 = vector.load %arg2[%c0, %c0_0] : memref<48x128xf32, #tpu.memory_space<vmem>>, vector<48x128xf32>
    %cst = arith.constant 0.000000e+00 : f32
    %1 = vector.broadcast %cst : f32 to vector<48x128xf32>
    %2 = arith.subf %0, %1 : vector<48x128xf32>
    %cst_1 = arith.constant 3.000000e+01 : f32
    %3 = vector.broadcast %cst_1 : f32 to vector<48x128xf32>
    %4 = arith.mulf %2, %3 : vector<48x128xf32>
    %5 = arith.fptosi %4 : vector<48x128xf32> to vector<48x128xi32>
    %c0_i32 = arith.constant 0 : i32
    %c29_i32 = arith.constant 29 : i32
    %6 = vector.broadcast %c0_i32 : i32 to vector<48x128xi32>
    %7 = arith.maxsi %6, %5 : vector<48x128xi32>
    %8 = vector.broadcast %c29_i32 : i32 to vector<48x128xi32>
    %9 = arith.minsi %8, %7 : vector<48x128xi32>
    %cst_2 = arith.constant 0.000000e+00 : f32
    %10 = vector.broadcast %cst_2 : f32 to vector<48x128xf32>
    %cst_3 = arith.constant 0.000000e+00 : f32
    %11 = vector.broadcast %cst_3 : f32 to vector<48x128xf32>
    %c0_i32_4 = arith.constant 0 : i32
    %12 = vector.broadcast %c0_i32_4 : i32 to vector<48x128xi32>
    %13 = arith.cmpi eq, %9, %12 : vector<48x128xi32>
    %c0_5 = arith.constant 0 : index
    %c0_6 = arith.constant 0 : index
    %14 = memref.load %arg1[%c0_5, %c0_6] : memref<16x128xf32, #tpu.memory_space<smem>>
    %15 = vector.broadcast %14 : f32 to vector<48x128xf32>
    %16 = arith.select %13, %15, %10 : vector<48x128xi1>, vector<48x128xf32>
    %c8 = arith.constant 8 : index
    %c0_7 = arith.constant 0 : index
    %17 = memref.load %arg1[%c8, %c0_7] : memref<16x128xf32, #tpu.memory_space<smem>>
    %18 = vector.broadcast %17 : f32 to vector<48x128xf32>
    %19 = arith.select %13, %18, %11 : vector<48x128xi1>, vector<48x128xf32>
    %c1_i32 = arith.constant 1 : i32
    %20 = vector.broadcast %c1_i32 : i32 to vector<48x128xi32>
    %21 = arith.cmpi eq, %9, %20 : vector<48x128xi32>
    %c0_8 = arith.constant 0 : index
    %c1 = arith.constant 1 : index
    %22 = memref.load %arg1[%c0_8, %c1] : memref<16x128xf32, #tpu.memory_space<smem>>
    %23 = vector.broadcast %22 : f32 to vector<48x128xf32>
    %24 = arith.select %21, %23, %16 : vector<48x128xi1>, vector<48x128xf32>
    %c8_9 = arith.constant 8 : index
    %c1_10 = arith.constant 1 : index
    %25 = memref.load %arg1[%c8_9, %c1_10] : memref<16x128xf32, #tpu.memory_space<smem>>
    %26 = vector.broadcast %25 : f32 to vector<48x128xf32>
    %27 = arith.select %21, %26, %19 : vector<48x128xi1>, vector<48x128xf32>
    %c2_i32 = arith.constant 2 : i32
    %28 = vector.broadcast %c2_i32 : i32 to vector<48x128xi32>
    %29 = arith.cmpi eq, %9, %28 : vector<48x128xi32>
    %c0_11 = arith.constant 0 : index
    %c2 = arith.constant 2 : index
    %30 = memref.load %arg1[%c0_11, %c2] : memref<16x128xf32, #tpu.memory_space<smem>>
    %31 = vector.broadcast %30 : f32 to vector<48x128xf32>
    %32 = arith.select %29, %31, %24 : vector<48x128xi1>, vector<48x128xf32>
    %c8_12 = arith.constant 8 : index
    %c2_13 = arith.constant 2 : index
    %33 = memref.load %arg1[%c8_12, %c2_13] : memref<16x128xf32, #tpu.memory_space<smem>>
    %34 = vector.broadcast %33 : f32 to vector<48x128xf32>
    %35 = arith.select %29, %34, %27 : vector<48x128xi1>, vector<48x128xf32>
    %c3_i32 = arith.constant 3 : i32
    %36 = vector.broadcast %c3_i32 : i32 to vector<48x128xi32>
    %37 = arith.cmpi eq, %9, %36 : vector<48x128xi32>
    %c0_14 = arith.constant 0 : index
    %c3 = arith.constant 3 : index
    %38 = memref.load %arg1[%c0_14, %c3] : memref<16x128xf32, #tpu.memory_space<smem>>
    %39 = vector.broadcast %38 : f32 to vector<48x128xf32>
    %40 = arith.select %37, %39, %32 : vector<48x128xi1>, vector<48x128xf32>
    %c8_15 = arith.constant 8 : index
    %c3_16 = arith.constant 3 : index
    %41 = memref.load %arg1[%c8_15, %c3_16] : memref<16x128xf32, #tpu.memory_space<smem>>
    %42 = vector.broadcast %41 : f32 to vector<48x128xf32>
    %43 = arith.select %37, %42, %35 : vector<48x128xi1>, vector<48x128xf32>
    %c4_i32 = arith.constant 4 : i32
    %44 = vector.broadcast %c4_i32 : i32 to vector<48x128xi32>
    %45 = arith.cmpi eq, %9, %44 : vector<48x128xi32>
    %c0_17 = arith.constant 0 : index
    %c4 = arith.constant 4 : index
    %46 = memref.load %arg1[%c0_17, %c4] : memref<16x128xf32, #tpu.memory_space<smem>>
    %47 = vector.broadcast %46 : f32 to vector<48x128xf32>
    %48 = arith.select %45, %47, %40 : vector<48x128xi1>, vector<48x128xf32>
    %c8_18 = arith.constant 8 : index
    %c4_19 = arith.constant 4 : index
    %49 = memref.load %arg1[%c8_18, %c4_19] : memref<16x128xf32, #tpu.memory_space<smem>>
    %50 = vector.broadcast %49 : f32 to vector<48x128xf32>
    %51 = arith.select %45, %50, %43 : vector<48x128xi1>, vector<48x128xf32>
    %c5_i32 = arith.constant 5 : i32
    %52 = vector.broadcast %c5_i32 : i32 to vector<48x128xi32>
    %53 = arith.cmpi eq, %9, %52 : vector<48x128xi32>
    %c0_20 = arith.constant 0 : index
    %c5 = arith.constant 5 : index
    %54 = memref.load %arg1[%c0_20, %c5] : memref<16x128xf32, #tpu.memory_space<smem>>
    %55 = vector.broadcast %54 : f32 to vector<48x128xf32>
    %56 = arith.select %53, %55, %48 : vector<48x128xi1>, vector<48x128xf32>
    %c8_21 = arith.constant 8 : index
    %c5_22 = arith.constant 5 : index
    %57 = memref.load %arg1[%c8_21, %c5_22] : memref<16x128xf32, #tpu.memory_space<smem>>
    %58 = vector.broadcast %57 : f32 to vector<48x128xf32>
    %59 = arith.select %53, %58, %51 : vector<48x128xi1>, vector<48x128xf32>
    %c6_i32 = arith.constant 6 : i32
    %60 = vector.broadcast %c6_i32 : i32 to vector<48x128xi32>
    %61 = arith.cmpi eq, %9, %60 : vector<48x128xi32>
    %c0_23 = arith.constant 0 : index
    %c6 = arith.constant 6 : index
    %62 = memref.load %arg1[%c0_23, %c6] : memref<16x128xf32, #tpu.memory_space<smem>>
    %63 = vector.broadcast %62 : f32 to vector<48x128xf32>
    %64 = arith.select %61, %63, %56 : vector<48x128xi1>, vector<48x128xf32>
    %c8_24 = arith.constant 8 : index
    %c6_25 = arith.constant 6 : index
    %65 = memref.load %arg1[%c8_24, %c6_25] : memref<16x128xf32, #tpu.memory_space<smem>>
    %66 = vector.broadcast %65 : f32 to vector<48x128xf32>
    %67 = arith.select %61, %66, %59 : vector<48x128xi1>, vector<48x128xf32>
    %c7_i32 = arith.constant 7 : i32
    %68 = vector.broadcast %c7_i32 : i32 to vector<48x128xi32>
    %69 = arith.cmpi eq, %9, %68 : vector<48x128xi32>
    %c0_26 = arith.constant 0 : index
    %c7 = arith.constant 7 : index
    %70 = memref.load %arg1[%c0_26, %c7] : memref<16x128xf32, #tpu.memory_space<smem>>
    %71 = vector.broadcast %70 : f32 to vector<48x128xf32>
    %72 = arith.select %69, %71, %64 : vector<48x128xi1>, vector<48x128xf32>
    %c8_27 = arith.constant 8 : index
    %c7_28 = arith.constant 7 : index
    %73 = memref.load %arg1[%c8_27, %c7_28] : memref<16x128xf32, #tpu.memory_space<smem>>
    %74 = vector.broadcast %73 : f32 to vector<48x128xf32>
    %75 = arith.select %69, %74, %67 : vector<48x128xi1>, vector<48x128xf32>
    %c8_i32 = arith.constant 8 : i32
    %76 = vector.broadcast %c8_i32 : i32 to vector<48x128xi32>
    %77 = arith.cmpi eq, %9, %76 : vector<48x128xi32>
    %c0_29 = arith.constant 0 : index
    %c8_30 = arith.constant 8 : index
    %78 = memref.load %arg1[%c0_29, %c8_30] : memref<16x128xf32, #tpu.memory_space<smem>>
    %79 = vector.broadcast %78 : f32 to vector<48x128xf32>
    %80 = arith.select %77, %79, %72 : vector<48x128xi1>, vector<48x128xf32>
    %c8_31 = arith.constant 8 : index
    %c8_32 = arith.constant 8 : index
    %81 = memref.load %arg1[%c8_31, %c8_32] : memref<16x128xf32, #tpu.memory_space<smem>>
    %82 = vector.broadcast %81 : f32 to vector<48x128xf32>
    %83 = arith.select %77, %82, %75 : vector<48x128xi1>, vector<48x128xf32>
    %c9_i32 = arith.constant 9 : i32
    %84 = vector.broadcast %c9_i32 : i32 to vector<48x128xi32>
    %85 = arith.cmpi eq, %9, %84 : vector<48x128xi32>
    %c0_33 = arith.constant 0 : index
    %c9 = arith.constant 9 : index
    %86 = memref.load %arg1[%c0_33, %c9] : memref<16x128xf32, #tpu.memory_space<smem>>
    %87 = vector.broadcast %86 : f32 to vector<48x128xf32>
    %88 = arith.select %85, %87, %80 : vector<48x128xi1>, vector<48x128xf32>
    %c8_34 = arith.constant 8 : index
    %c9_35 = arith.constant 9 : index
    %89 = memref.load %arg1[%c8_34, %c9_35] : memref<16x128xf32, #tpu.memory_space<smem>>
    %90 = vector.broadcast %89 : f32 to vector<48x128xf32>
    %91 = arith.select %85, %90, %83 : vector<48x128xi1>, vector<48x128xf32>
    %c10_i32 = arith.constant 10 : i32
    %92 = vector.broadcast %c10_i32 : i32 to vector<48x128xi32>
    %93 = arith.cmpi eq, %9, %92 : vector<48x128xi32>
    %c0_36 = arith.constant 0 : index
    %c10 = arith.constant 10 : index
    %94 = memref.load %arg1[%c0_36, %c10] : memref<16x128xf32, #tpu.memory_space<smem>>
    %95 = vector.broadcast %94 : f32 to vector<48x128xf32>
    %96 = arith.select %93, %95, %88 : vector<48x128xi1>, vector<48x128xf32>
    %c8_37 = arith.constant 8 : index
    %c10_38 = arith.constant 10 : index
    %97 = memref.load %arg1[%c8_37, %c10_38] : memref<16x128xf32, #tpu.memory_space<smem>>
    %98 = vector.broadcast %97 : f32 to vector<48x128xf32>
    %99 = arith.select %93, %98, %91 : vector<48x128xi1>, vector<48x128xf32>
    %c11_i32 = arith.constant 11 : i32
    %100 = vector.broadcast %c11_i32 : i32 to vector<48x128xi32>
    %101 = arith.cmpi eq, %9, %100 : vector<48x128xi32>
    %c0_39 = arith.constant 0 : index
    %c11 = arith.constant 11 : index
    %102 = memref.load %arg1[%c0_39, %c11] : memref<16x128xf32, #tpu.memory_space<smem>>
    %103 = vector.broadcast %102 : f32 to vector<48x128xf32>
    %104 = arith.select %101, %103, %96 : vector<48x128xi1>, vector<48x128xf32>
    %c8_40 = arith.constant 8 : index
    %c11_41 = arith.constant 11 : index
    %105 = memref.load %arg1[%c8_40, %c11_41] : memref<16x128xf32, #tpu.memory_space<smem>>
    %106 = vector.broadcast %105 : f32 to vector<48x128xf32>
    %107 = arith.select %101, %106, %99 : vector<48x128xi1>, vector<48x128xf32>
    %c12_i32 = arith.constant 12 : i32
    %108 = vector.broadcast %c12_i32 : i32 to vector<48x128xi32>
    %109 = arith.cmpi eq, %9, %108 : vector<48x128xi32>
    %c0_42 = arith.constant 0 : index
    %c12 = arith.constant 12 : index
    %110 = memref.load %arg1[%c0_42, %c12] : memref<16x128xf32, #tpu.memory_space<smem>>
    %111 = vector.broadcast %110 : f32 to vector<48x128xf32>
    %112 = arith.select %109, %111, %104 : vector<48x128xi1>, vector<48x128xf32>
    %c8_43 = arith.constant 8 : index
    %c12_44 = arith.constant 12 : index
    %113 = memref.load %arg1[%c8_43, %c12_44] : memref<16x128xf32, #tpu.memory_space<smem>>
    %114 = vector.broadcast %113 : f32 to vector<48x128xf32>
    %115 = arith.select %109, %114, %107 : vector<48x128xi1>, vector<48x128xf32>
    %c13_i32 = arith.constant 13 : i32
    %116 = vector.broadcast %c13_i32 : i32 to vector<48x128xi32>
    %117 = arith.cmpi eq, %9, %116 : vector<48x128xi32>
    %c0_45 = arith.constant 0 : index
    %c13 = arith.constant 13 : index
    %118 = memref.load %arg1[%c0_45, %c13] : memref<16x128xf32, #tpu.memory_space<smem>>
    %119 = vector.broadcast %118 : f32 to vector<48x128xf32>
    %120 = arith.select %117, %119, %112 : vector<48x128xi1>, vector<48x128xf32>
    %c8_46 = arith.constant 8 : index
    %c13_47 = arith.constant 13 : index
    %121 = memref.load %arg1[%c8_46, %c13_47] : memref<16x128xf32, #tpu.memory_space<smem>>
    %122 = vector.broadcast %121 : f32 to vector<48x128xf32>
    %123 = arith.select %117, %122, %115 : vector<48x128xi1>, vector<48x128xf32>
    %c14_i32 = arith.constant 14 : i32
    %124 = vector.broadcast %c14_i32 : i32 to vector<48x128xi32>
    %125 = arith.cmpi eq, %9, %124 : vector<48x128xi32>
    %c0_48 = arith.constant 0 : index
    %c14 = arith.constant 14 : index
    %126 = memref.load %arg1[%c0_48, %c14] : memref<16x128xf32, #tpu.memory_space<smem>>
    %127 = vector.broadcast %126 : f32 to vector<48x128xf32>
    %128 = arith.select %125, %127, %120 : vector<48x128xi1>, vector<48x128xf32>
    %c8_49 = arith.constant 8 : index
    %c14_50 = arith.constant 14 : index
    %129 = memref.load %arg1[%c8_49, %c14_50] : memref<16x128xf32, #tpu.memory_space<smem>>
    %130 = vector.broadcast %129 : f32 to vector<48x128xf32>
    %131 = arith.select %125, %130, %123 : vector<48x128xi1>, vector<48x128xf32>
    %c15_i32 = arith.constant 15 : i32
    %132 = vector.broadcast %c15_i32 : i32 to vector<48x128xi32>
    %133 = arith.cmpi eq, %9, %132 : vector<48x128xi32>
    %c0_51 = arith.constant 0 : index
    %c15 = arith.constant 15 : index
    %134 = memref.load %arg1[%c0_51, %c15] : memref<16x128xf32, #tpu.memory_space<smem>>
    %135 = vector.broadcast %134 : f32 to vector<48x128xf32>
    %136 = arith.select %133, %135, %128 : vector<48x128xi1>, vector<48x128xf32>
    %c8_52 = arith.constant 8 : index
    %c15_53 = arith.constant 15 : index
    %137 = memref.load %arg1[%c8_52, %c15_53] : memref<16x128xf32, #tpu.memory_space<smem>>
    %138 = vector.broadcast %137 : f32 to vector<48x128xf32>
    %139 = arith.select %133, %138, %131 : vector<48x128xi1>, vector<48x128xf32>
    %c16_i32 = arith.constant 16 : i32
    %140 = vector.broadcast %c16_i32 : i32 to vector<48x128xi32>
    %141 = arith.cmpi eq, %9, %140 : vector<48x128xi32>
    %c0_54 = arith.constant 0 : index
    %c16 = arith.constant 16 : index
    %142 = memref.load %arg1[%c0_54, %c16] : memref<16x128xf32, #tpu.memory_space<smem>>
    %143 = vector.broadcast %142 : f32 to vector<48x128xf32>
    %144 = arith.select %141, %143, %136 : vector<48x128xi1>, vector<48x128xf32>
    %c8_55 = arith.constant 8 : index
    %c16_56 = arith.constant 16 : index
    %145 = memref.load %arg1[%c8_55, %c16_56] : memref<16x128xf32, #tpu.memory_space<smem>>
    %146 = vector.broadcast %145 : f32 to vector<48x128xf32>
    %147 = arith.select %141, %146, %139 : vector<48x128xi1>, vector<48x128xf32>
    %c17_i32 = arith.constant 17 : i32
    %148 = vector.broadcast %c17_i32 : i32 to vector<48x128xi32>
    %149 = arith.cmpi eq, %9, %148 : vector<48x128xi32>
    %c0_57 = arith.constant 0 : index
    %c17 = arith.constant 17 : index
    %150 = memref.load %arg1[%c0_57, %c17] : memref<16x128xf32, #tpu.memory_space<smem>>
    %151 = vector.broadcast %150 : f32 to vector<48x128xf32>
    %152 = arith.select %149, %151, %144 : vector<48x128xi1>, vector<48x128xf32>
    %c8_58 = arith.constant 8 : index
    %c17_59 = arith.constant 17 : index
    %153 = memref.load %arg1[%c8_58, %c17_59] : memref<16x128xf32, #tpu.memory_space<smem>>
    %154 = vector.broadcast %153 : f32 to vector<48x128xf32>
    %155 = arith.select %149, %154, %147 : vector<48x128xi1>, vector<48x128xf32>
    %c18_i32 = arith.constant 18 : i32
    %156 = vector.broadcast %c18_i32 : i32 to vector<48x128xi32>
    %157 = arith.cmpi eq, %9, %156 : vector<48x128xi32>
    %c0_60 = arith.constant 0 : index
    %c18 = arith.constant 18 : index
    %158 = memref.load %arg1[%c0_60, %c18] : memref<16x128xf32, #tpu.memory_space<smem>>
    %159 = vector.broadcast %158 : f32 to vector<48x128xf32>
    %160 = arith.select %157, %159, %152 : vector<48x128xi1>, vector<48x128xf32>
    %c8_61 = arith.constant 8 : index
    %c18_62 = arith.constant 18 : index
    %161 = memref.load %arg1[%c8_61, %c18_62] : memref<16x128xf32, #tpu.memory_space<smem>>
    %162 = vector.broadcast %161 : f32 to vector<48x128xf32>
    %163 = arith.select %157, %162, %155 : vector<48x128xi1>, vector<48x128xf32>
    %c19_i32 = arith.constant 19 : i32
    %164 = vector.broadcast %c19_i32 : i32 to vector<48x128xi32>
    %165 = arith.cmpi eq, %9, %164 : vector<48x128xi32>
    %c0_63 = arith.constant 0 : index
    %c19 = arith.constant 19 : index
    %166 = memref.load %arg1[%c0_63, %c19] : memref<16x128xf32, #tpu.memory_space<smem>>
    %167 = vector.broadcast %166 : f32 to vector<48x128xf32>
    %168 = arith.select %165, %167, %160 : vector<48x128xi1>, vector<48x128xf32>
    %c8_64 = arith.constant 8 : index
    %c19_65 = arith.constant 19 : index
    %169 = memref.load %arg1[%c8_64, %c19_65] : memref<16x128xf32, #tpu.memory_space<smem>>
    %170 = vector.broadcast %169 : f32 to vector<48x128xf32>
    %171 = arith.select %165, %170, %163 : vector<48x128xi1>, vector<48x128xf32>
    %c20_i32 = arith.constant 20 : i32
    %172 = vector.broadcast %c20_i32 : i32 to vector<48x128xi32>
    %173 = arith.cmpi eq, %9, %172 : vector<48x128xi32>
    %c0_66 = arith.constant 0 : index
    %c20 = arith.constant 20 : index
    %174 = memref.load %arg1[%c0_66, %c20] : memref<16x128xf32, #tpu.memory_space<smem>>
    %175 = vector.broadcast %174 : f32 to vector<48x128xf32>
    %176 = arith.select %173, %175, %168 : vector<48x128xi1>, vector<48x128xf32>
    %c8_67 = arith.constant 8 : index
    %c20_68 = arith.constant 20 : index
    %177 = memref.load %arg1[%c8_67, %c20_68] : memref<16x128xf32, #tpu.memory_space<smem>>
    %178 = vector.broadcast %177 : f32 to vector<48x128xf32>
    %179 = arith.select %173, %178, %171 : vector<48x128xi1>, vector<48x128xf32>
    %c21_i32 = arith.constant 21 : i32
    %180 = vector.broadcast %c21_i32 : i32 to vector<48x128xi32>
    %181 = arith.cmpi eq, %9, %180 : vector<48x128xi32>
    %c0_69 = arith.constant 0 : index
    %c21 = arith.constant 21 : index
    %182 = memref.load %arg1[%c0_69, %c21] : memref<16x128xf32, #tpu.memory_space<smem>>
    %183 = vector.broadcast %182 : f32 to vector<48x128xf32>
    %184 = arith.select %181, %183, %176 : vector<48x128xi1>, vector<48x128xf32>
    %c8_70 = arith.constant 8 : index
    %c21_71 = arith.constant 21 : index
    %185 = memref.load %arg1[%c8_70, %c21_71] : memref<16x128xf32, #tpu.memory_space<smem>>
    %186 = vector.broadcast %185 : f32 to vector<48x128xf32>
    %187 = arith.select %181, %186, %179 : vector<48x128xi1>, vector<48x128xf32>
    %c22_i32 = arith.constant 22 : i32
    %188 = vector.broadcast %c22_i32 : i32 to vector<48x128xi32>
    %189 = arith.cmpi eq, %9, %188 : vector<48x128xi32>
    %c0_72 = arith.constant 0 : index
    %c22 = arith.constant 22 : index
    %190 = memref.load %arg1[%c0_72, %c22] : memref<16x128xf32, #tpu.memory_space<smem>>
    %191 = vector.broadcast %190 : f32 to vector<48x128xf32>
    %192 = arith.select %189, %191, %184 : vector<48x128xi1>, vector<48x128xf32>
    %c8_73 = arith.constant 8 : index
    %c22_74 = arith.constant 22 : index
    %193 = memref.load %arg1[%c8_73, %c22_74] : memref<16x128xf32, #tpu.memory_space<smem>>
    %194 = vector.broadcast %193 : f32 to vector<48x128xf32>
    %195 = arith.select %189, %194, %187 : vector<48x128xi1>, vector<48x128xf32>
    %c23_i32 = arith.constant 23 : i32
    %196 = vector.broadcast %c23_i32 : i32 to vector<48x128xi32>
    %197 = arith.cmpi eq, %9, %196 : vector<48x128xi32>
    %c0_75 = arith.constant 0 : index
    %c23 = arith.constant 23 : index
    %198 = memref.load %arg1[%c0_75, %c23] : memref<16x128xf32, #tpu.memory_space<smem>>
    %199 = vector.broadcast %198 : f32 to vector<48x128xf32>
    %200 = arith.select %197, %199, %192 : vector<48x128xi1>, vector<48x128xf32>
    %c8_76 = arith.constant 8 : index
    %c23_77 = arith.constant 23 : index
    %201 = memref.load %arg1[%c8_76, %c23_77] : memref<16x128xf32, #tpu.memory_space<smem>>
    %202 = vector.broadcast %201 : f32 to vector<48x128xf32>
    %203 = arith.select %197, %202, %195 : vector<48x128xi1>, vector<48x128xf32>
    %c24_i32 = arith.constant 24 : i32
    %204 = vector.broadcast %c24_i32 : i32 to vector<48x128xi32>
    %205 = arith.cmpi eq, %9, %204 : vector<48x128xi32>
    %c0_78 = arith.constant 0 : index
    %c24 = arith.constant 24 : index
    %206 = memref.load %arg1[%c0_78, %c24] : memref<16x128xf32, #tpu.memory_space<smem>>
    %207 = vector.broadcast %206 : f32 to vector<48x128xf32>
    %208 = arith.select %205, %207, %200 : vector<48x128xi1>, vector<48x128xf32>
    %c8_79 = arith.constant 8 : index
    %c24_80 = arith.constant 24 : index
    %209 = memref.load %arg1[%c8_79, %c24_80] : memref<16x128xf32, #tpu.memory_space<smem>>
    %210 = vector.broadcast %209 : f32 to vector<48x128xf32>
    %211 = arith.select %205, %210, %203 : vector<48x128xi1>, vector<48x128xf32>
    %c25_i32 = arith.constant 25 : i32
    %212 = vector.broadcast %c25_i32 : i32 to vector<48x128xi32>
    %213 = arith.cmpi eq, %9, %212 : vector<48x128xi32>
    %c0_81 = arith.constant 0 : index
    %c25 = arith.constant 25 : index
    %214 = memref.load %arg1[%c0_81, %c25] : memref<16x128xf32, #tpu.memory_space<smem>>
    %215 = vector.broadcast %214 : f32 to vector<48x128xf32>
    %216 = arith.select %213, %215, %208 : vector<48x128xi1>, vector<48x128xf32>
    %c8_82 = arith.constant 8 : index
    %c25_83 = arith.constant 25 : index
    %217 = memref.load %arg1[%c8_82, %c25_83] : memref<16x128xf32, #tpu.memory_space<smem>>
    %218 = vector.broadcast %217 : f32 to vector<48x128xf32>
    %219 = arith.select %213, %218, %211 : vector<48x128xi1>, vector<48x128xf32>
    %c26_i32 = arith.constant 26 : i32
    %220 = vector.broadcast %c26_i32 : i32 to vector<48x128xi32>
    %221 = arith.cmpi eq, %9, %220 : vector<48x128xi32>
    %c0_84 = arith.constant 0 : index
    %c26 = arith.constant 26 : index
    %222 = memref.load %arg1[%c0_84, %c26] : memref<16x128xf32, #tpu.memory_space<smem>>
    %223 = vector.broadcast %222 : f32 to vector<48x128xf32>
    %224 = arith.select %221, %223, %216 : vector<48x128xi1>, vector<48x128xf32>
    %c8_85 = arith.constant 8 : index
    %c26_86 = arith.constant 26 : index
    %225 = memref.load %arg1[%c8_85, %c26_86] : memref<16x128xf32, #tpu.memory_space<smem>>
    %226 = vector.broadcast %225 : f32 to vector<48x128xf32>
    %227 = arith.select %221, %226, %219 : vector<48x128xi1>, vector<48x128xf32>
    %c27_i32 = arith.constant 27 : i32
    %228 = vector.broadcast %c27_i32 : i32 to vector<48x128xi32>
    %229 = arith.cmpi eq, %9, %228 : vector<48x128xi32>
    %c0_87 = arith.constant 0 : index
    %c27 = arith.constant 27 : index
    %230 = memref.load %arg1[%c0_87, %c27] : memref<16x128xf32, #tpu.memory_space<smem>>
    %231 = vector.broadcast %230 : f32 to vector<48x128xf32>
    %232 = arith.select %229, %231, %224 : vector<48x128xi1>, vector<48x128xf32>
    %c8_88 = arith.constant 8 : index
    %c27_89 = arith.constant 27 : index
    %233 = memref.load %arg1[%c8_88, %c27_89] : memref<16x128xf32, #tpu.memory_space<smem>>
    %234 = vector.broadcast %233 : f32 to vector<48x128xf32>
    %235 = arith.select %229, %234, %227 : vector<48x128xi1>, vector<48x128xf32>
    %c28_i32 = arith.constant 28 : i32
    %236 = vector.broadcast %c28_i32 : i32 to vector<48x128xi32>
    %237 = arith.cmpi eq, %9, %236 : vector<48x128xi32>
    %c0_90 = arith.constant 0 : index
    %c28 = arith.constant 28 : index
    %238 = memref.load %arg1[%c0_90, %c28] : memref<16x128xf32, #tpu.memory_space<smem>>
    %239 = vector.broadcast %238 : f32 to vector<48x128xf32>
    %240 = arith.select %237, %239, %232 : vector<48x128xi1>, vector<48x128xf32>
    %c8_91 = arith.constant 8 : index
    %c28_92 = arith.constant 28 : index
    %241 = memref.load %arg1[%c8_91, %c28_92] : memref<16x128xf32, #tpu.memory_space<smem>>
    %242 = vector.broadcast %241 : f32 to vector<48x128xf32>
    %243 = arith.select %237, %242, %235 : vector<48x128xi1>, vector<48x128xf32>
    %c29_i32_93 = arith.constant 29 : i32
    %244 = vector.broadcast %c29_i32_93 : i32 to vector<48x128xi32>
    %245 = arith.cmpi eq, %9, %244 : vector<48x128xi32>
    %c0_94 = arith.constant 0 : index
    %c29 = arith.constant 29 : index
    %246 = memref.load %arg1[%c0_94, %c29] : memref<16x128xf32, #tpu.memory_space<smem>>
    %247 = vector.broadcast %246 : f32 to vector<48x128xf32>
    %248 = arith.select %245, %247, %240 : vector<48x128xi1>, vector<48x128xf32>
    %c8_95 = arith.constant 8 : index
    %c29_96 = arith.constant 29 : index
    %249 = memref.load %arg1[%c8_95, %c29_96] : memref<16x128xf32, #tpu.memory_space<smem>>
    %250 = vector.broadcast %249 : f32 to vector<48x128xf32>
    %251 = arith.select %245, %250, %243 : vector<48x128xi1>, vector<48x128xf32>
    %252 = arith.sitofp %9 : vector<48x128xi32> to vector<48x128xf32>
    %cst_97 = arith.constant 0.0333333351 : f32
    %253 = vector.broadcast %cst_97 : f32 to vector<48x128xf32>
    %254 = arith.mulf %252, %253 : vector<48x128xf32>
    %cst_98 = arith.constant 0.000000e+00 : f32
    %255 = vector.broadcast %cst_98 : f32 to vector<48x128xf32>
    %256 = arith.addf %255, %254 : vector<48x128xf32>
    %257 = arith.subf %0, %256 : vector<48x128xf32>
    %258 = arith.mulf %257, %248 : vector<48x128xf32>
    %259 = arith.addf %258, %251 : vector<48x128xf32>
    %cst_99 = arith.constant 0.000000e+00 : f32
    %cst_100 = arith.constant 1.000000e+00 : f32
    %260 = vector.broadcast %cst_99 : f32 to vector<48x128xf32>
    %261 = arith.maximumf %260, %259 : vector<48x128xf32>
    %262 = vector.broadcast %cst_100 : f32 to vector<48x128xf32>
    %263 = arith.minimumf %262, %261 : vector<48x128xf32>
    %c0_101 = arith.constant 0 : index
    %c0_102 = arith.constant 0 : index
    %264 = vector.load %arg3[%c0_101, %c0_102] : memref<48x128xf32, #tpu.memory_space<vmem>>, vector<48x128xf32>
    tpu.vector_store %arg3[%c0_101, %c0_102], %263 {strides = array<i32>} : memref<48x128xf32, #tpu.memory_space<vmem>>, vector<48x128xf32>,
    return
  }
  func.func @transform_0(%arg0: i32) -> (i32, i32) {
    %c0_i32 = arith.constant 0 : i32
    %c0_i32_0 = arith.constant 0 : i32
    %c0_i32_1 = arith.constant 0 : i32
    return %c0_i32, %c0_i32_0 : i32, i32
  }
  func.func @transform_1(%arg0: i32) -> (i32, i32) {
    %c0_i32 = arith.constant 0 : i32
    %c0_i32_0 = arith.constant 0 : i32
    return %arg0, %c0_i32 : i32, i32
  }
  func.func @transform_2(%arg0: i32) -> (i32, i32) {
    %c0_i32 = arith.constant 0 : i32
    %c0_i32_0 = arith.constant 0 : i32
    return %arg0, %c0_i32 : i32, i32
  }
}

</mosaic_0001>

<bundles_post_ra>
// kernel: tpu_custom_call.1
= control target key start
LH: loop header
LB: loop body
LE: loop exit
PB: predicated region body
PF: predicated region fallthrough
CT: control target
= control target key end

     0   :  { %7 = vsyncpa [#allocation5], 0  ;;  %s2109_s0 = inlined_call_operand.hbm [shape: f32[16,128], index: 0, kind: input, shape index: {}]   ;;  %s2110_s1 = inlined_call_operand.hbm [shape: f32[48,128], index: 1, kind: input, shape index: {}]   ;;  %s2111_s2 = inlined_call_operand.hbm [shape: f32[48,128], index: 2, kind: output, shape index: {}]  }
   0x1   :  { %8 = vsyncpa [#allocation3], 0 }
   0x2   :  { %9 = vsyncpa [#allocation4], 0  ;;  %s895_s11 = scalar_lea.hbm %s2109_s0, 256 }
   0x3   :  { %p896_p0 = scmp.ne.s32.totalorder %s2109_s0, %s895_s11  ;;  %p899_p1 = scmp.lt.u32.totalorder %s895_s11, %s2109_s0 }
   0x5   :  { %p901_p2 = pnand %p899_p1, %p896_p0 }
   0x7   :  { %904 = shalt.err (!%p901_p2)
}
   0x8   :  { %s955_s16 = smov [#allocation2]   ;;  %s956_s17 = smov 128  }
   0x9   :  { %s957_s18 = smov 8   ;;  %s958_s21 = smov [#allocation6]  }
   0xa   :  { %19 = dma.hbm_to_smem %s2109_s0, 256, %s955_s16, [#allocation5], %s956_s17, %s956_s17, %s957_s18  }
   0xb   :  { %s25_s22 = sshll.u32 %s958_s21, 4  ;;  %s905_s25 = scalar_lea.hbm %s2110_s1, 768  ;;  %s26_s22 = int_to_ptr.vmem [resolvable:$true] %s25_s22 }
   0xc   :  { %p906_p3 = scmp.ne.s32.totalorder %s2110_s1, %s905_s25  ;;  %p909_p4 = scmp.lt.u32.totalorder %s905_s25, %s2110_s1 }
   0xe   :  { %p911_p5 = pnand %p909_p4, %p906_p3 }
  0x10   :  { %914 = shalt.err (!%p911_p5)
}
  0x11   :  { %s915_s30 = scalar_lea.vmem %s26_s22, 768  ;;  %p920_p7 = scmp.lt.s32.totalorder %s26_s22, %s26_s22 }
  0x12   :  { %p916_p6 = scmp.ne.s32.totalorder %s26_s22, %s915_s30  ;;  %p921_p8 = scmp.lt.s32.totalorder %s915_s30, %s915_s30 }
  0x14   :  { %p922_p9 = por %p921_p8, %p920_p7 }
  0x16   :  { %p923_p10 = pnand %p922_p9, %p916_p6 }
  0x18   :  { %926 = shalt.err (!%p923_p10)
}
  0x19   :  { %31 = dma.hbm_to_vmem [thread:$0]  %s2110_s1, 768, %s26_s22, [#allocation3], %s956_s17, %s956_s17, %s957_s18  }
  0x1a   :  { %949 = dma.done.wait [#allocation5], 256  }
  0x1b   :  { %950 = vsyncadd [#allocation5], 4294967040 }
  0x1c   :  { %951 = dma.done.wait [#allocation3], 768  }
  0x1d   :  { %952 = vsyncadd [#allocation3], 4294966528 }
  0x1e   :  { %38 = sfence }
  0x1f   :  { %v39_v0 = vld [vmem:[#allocation6] sm:$0xff]  ;;  %v40_v1 = vld [vmem:[#allocation6 + $0x8] sm:$0xff]  ;;  %v41_v2 = vld [vmem:[#allocation6 + $0x10] sm:$0xff]  ;;  %s1005_s1 = sld [smem:[#allocation2]]  ;;  %s814_s5 = sld [smem:[#allocation2 + $0x1]] }
  0x20   :  { %v42_v3 = vld [vmem:[#allocation6 + $0x18] sm:$0xff]  ;;  %v43_v4 = vld [vmem:[#allocation6 + $0x20] sm:$0xff]  ;;  %v44_v5 = vld [vmem:[#allocation6 + $0x28] sm:$0xff]  ;;  %v45_v6 = vmul.f32 30.0, %v39_v0  ;;  %v46_v7 = vmul.f32 30.0, %v40_v1  ;;  %v47_v8 = vmul.f32 30.0, %v41_v2 }
  0x21   :  { %v48_v9 = vmul.f32 30.0, %v42_v3  ;;  %v49_v10 = vmul.f32 30.0, %v43_v4  ;;  %v50_v11 = vmul.f32 30.0, %v44_v5  ;;  %s813_s4 = sld [smem:[#allocation2 + $0x400]]  ;;  %s815_s6 = sld [smem:[#allocation2 + $0x401]] }
  0x22   :  { %v872_v12 = vtrunc.f32 %v45_v6  ;;  %v874_v13 = vtrunc.f32 %v46_v7  ;;  %v876_v14 = vtrunc.f32 %v47_v8  ;;  %s1028_s7 = sld [smem:[#allocation2 + $0x2]]  ;;  %s1062_s9 = sld [smem:[#allocation2 + $0x3]] }
  0x23   :  { %v878_v15 = vtrunc.f32 %v48_v9  ;;  %v880_v16 = vtrunc.f32 %v49_v10  ;;  %v882_v17 = vtrunc.f32 %v50_v11  ;;  %s1038_s8 = sld [smem:[#allocation2 + $0x402]]  ;;  %s1072_s10 = sld [smem:[#allocation2 + $0x403]] }
  0x24   :  { %v873_v18 = vcvt.f32.s32 %v872_v12  ;;  %v875_v19 = vcvt.f32.s32 %v874_v13  ;;  %v877_v20 = vcvt.f32.s32 %v876_v14  ;;  %s1098_s11 = sld [smem:[#allocation2 + $0x4]]  ;;  %s1134_s13 = sld [smem:[#allocation2 + $0x5]] }
  0x25   :  { %v879_v21 = vcvt.f32.s32 %v878_v15  ;;  %v881_v22 = vcvt.f32.s32 %v880_v16  ;;  %v883_v23 = vcvt.f32.s32 %v882_v17  ;;  %v88_v36 = vstv %s1005_s1  ;;  %s1108_s12 = sld [smem:[#allocation2 + $0x404]]  ;;  %s1144_s14 = sld [smem:[#allocation2 + $0x405]] }
  0x26   :  { %vm57_vm0 = vcmp.gt.s32.totalorder %v873_v18, 0  ;;  %vm59_vm1 = vcmp.gt.s32.totalorder %v875_v19, 0  ;;  %vm61_vm2 = vcmp.gt.s32.totalorder %v877_v20, 0  ;;  %v110_v45 = vstv %s814_s5  ;;  %s1170_s15 = sld [smem:[#allocation2 + $0x6]]  ;;  %s1206_s19 = sld [smem:[#allocation2 + $0x7]] }
  0x27   :  { %v58_v24 = vsel %vm57_vm0, %v873_v18, 0  ;;  %v60_v25 = vsel %vm59_vm1, %v875_v19, 0  ;;  %v62_v26 = vsel %vm61_vm2, %v877_v20, 0  ;;  %vm63_vm3 = vcmp.gt.s32.totalorder %v879_v21, 0  ;;  %s1180_s16 = sld [smem:[#allocation2 + $0x406]]  ;;  %s1216_s20 = sld [smem:[#allocation2 + $0x407]] }
  0x28   :  { %v64_v27 = vsel %vm63_vm3, %v879_v21, 0  ;;  %vm65_vm4 = vcmp.gt.s32.totalorder %v881_v22, 0  ;;  %vm67_vm5 = vcmp.gt.s32.totalorder %v883_v23, 0  ;;  %vm69_vm6 = vcmp.lt.s32.totalorder %v58_v24, 29  ;;  %s1242_s21 = sld [smem:[#allocation2 + $0x8]]  ;;  %s1278_s23 = sld [smem:[#allocation2 + $0x9]] }
  0x29   :  { %v66_v28 = vsel %vm65_vm4, %v881_v22, 0  ;;  %v68_v29 = vsel %vm67_vm5, %v883_v23, 0  ;;  %v1007_v30 = vsel %vm69_vm6, %v58_v24, 29  ;;  %vm71_vm7 = vcmp.lt.s32.totalorder %v60_v25, 29  ;;  %s1252_s22 = sld [smem:[#allocation2 + $0x408]]  ;;  %s1288_s24 = sld [smem:[#allocation2 + $0x409]] }
  0x2a   :  { %v1009_v31 = vsel %vm71_vm7, %v60_v25, 29  ;;  %vm73_vm8 = vcmp.lt.s32.totalorder %v62_v26, 29  ;;  %vm75_vm9 = vcmp.lt.s32.totalorder %v64_v27, 29  ;;  %vm77_vm10 = vcmp.lt.s32.totalorder %v66_v28, 29  ;;  %s1314_s25 = sld [smem:[#allocation2 + $0xa]]  ;;  %s1350_s27 = sld [smem:[#allocation2 + $0xb]] }
  0x2b   :  { %v1011_v32 = vsel %vm73_vm8, %v62_v26, 29  ;;  %v1013_v33 = vsel %vm75_vm9, %v64_v27, 29  ;;  %v1015_v34 = vsel %vm77_vm10, %v66_v28, 29  ;;  %vm79_vm11 = vcmp.lt.s32.totalorder %v68_v29, 29  ;;  %s1324_s26 = sld [smem:[#allocation2 + $0x40a]]  ;;  %s1360_s28 = sld [smem:[#allocation2 + $0x40b]] }
  0x2c   :  { %v1017_v35 = vsel %vm79_vm11, %v68_v29, 29  ;;  %vm81_vm12 = vcmp.eq.s32.totalorder %v1007_v30, 0  ;;  %vm82_vm13 = vcmp.eq.s32.totalorder %v1009_v31, 0  ;;  %vm83_vm14 = vcmp.eq.s32.totalorder %v1011_v32, 0  ;;  %s1386_s29 = sld [smem:[#allocation2 + $0xc]]  ;;  %s1422_s0 = sld [smem:[#allocation2 + $0xd]] }
  0x2d   :  { %vm84_vm15 = vcmp.eq.s32.totalorder %v1013_v33, 0  ;;  %vm85_vm0 = vcmp.eq.s32.totalorder %v1015_v34, 0  ;;  %vm86_vm1 = vcmp.eq.s32.totalorder %v1017_v35, 0  ;;  %v89_v37 = vsel %vm81_vm12, %v88_v36, 0.0  ;;  %s1396_s30 = sld [smem:[#allocation2 + $0x40c]]  ;;  %s1432_s3 = sld [smem:[#allocation2 + $0x40d]] }
  0x2e   :  { %v96_v38 = vstv %s813_s4  ;;  %v90_v39 = vsel %vm82_vm13, %v88_v36, 0.0  ;;  %v91_v40 = vsel %vm83_vm14, %v88_v36, 0.0  ;;  %v92_v41 = vsel %vm84_vm15, %v88_v36, 0.0  ;;  %s1458_s1 = sld [smem:[#allocation2 + $0xe]]  ;;  %s1494_s5 = sld [smem:[#allocation2 + $0xf]] }
  0x2f   :  { %v93_v42 = vsel %vm85_vm0, %v88_v36, 0.0  ;;  %v94_v43 = vsel %vm86_vm1, %v88_v36, 0.0  ;;  %v97_v44 = vsel %vm81_vm12, %v96_v38, 0.0  ;;  %vm103_vm2 = vcmp.eq.s32.totalorder %v1007_v30, 1  ;;  %s1468_s4 = sld [smem:[#allocation2 + $0x40e]] }
  0x30   :  { %vm104_vm3 = vcmp.eq.s32.totalorder %v1009_v31, 1  ;;  %vm105_vm4 = vcmp.eq.s32.totalorder %v1011_v32, 1  ;;  %vm106_vm5 = vcmp.eq.s32.totalorder %v1013_v33, 1  ;;  %vm107_vm6 = vcmp.eq.s32.totalorder %v1015_v34, 1 }
  0x31   :  { %v98_v46 = vsel %vm82_vm13, %v96_v38, 0.0  ;;  %v99_v47 = vsel %vm83_vm14, %v96_v38, 0.0  ;;  %vm108_vm7 = vcmp.eq.s32.totalorder %v1017_v35, 1  ;;  %v118_v48 = vstv %s815_s6  ;;  %s1504_s6 = sld [smem:[#allocation2 + $0x40f]] }
  0x32   :  { %v100_v49 = vsel %vm84_vm15, %v96_v38, 0.0  ;;  %v101_v50 = vsel %vm85_vm0, %v96_v38, 0.0  ;;  %v102_v51 = vsel %vm86_vm1, %v96_v38, 0.0  ;;  %v111_v52 = vsel %vm103_vm2, %v110_v45, %v89_v37 }
  0x33   :  { %v112_v53 = vsel %vm104_vm3, %v110_v45, %v90_v39  ;;  %v113_v54 = vsel %vm105_vm4, %v110_v45, %v91_v40  ;;  %v114_v55 = vsel %vm106_vm5, %v110_v45, %v92_v41  ;;  %v115_v56 = vsel %vm107_vm6, %v110_v45, %v93_v42 }
  0x34   :  { %v116_v57 = vsel %vm108_vm7, %v110_v45, %v94_v43  ;;  %v119_v58 = vsel %vm103_vm2, %v118_v48, %v97_v44  ;;  %vm125_vm8 = vcmp.eq.s32.totalorder %v1007_v30, 2  ;;  %vm126_vm9 = vcmp.eq.s32.totalorder %v1009_v31, 2 }
  0x35   :  { %vm127_vm10 = vcmp.eq.s32.totalorder %v1011_v32, 2  ;;  %vm128_vm11 = vcmp.eq.s32.totalorder %v1013_v33, 2  ;;  %vm129_vm12 = vcmp.eq.s32.totalorder %v1015_v34, 2  ;;  %v132_v59 = vstv %s1028_s7  ;;  %s1530_s7 = sld [smem:[#allocation2 + $0x10]] }
  0x36   :  { %v120_v60 = vsel %vm104_vm3, %v118_v48, %v98_v46  ;;  %v121_v61 = vsel %vm105_vm4, %v118_v48, %v99_v47  ;;  %vm130_vm13 = vcmp.eq.s32.totalorder %v1017_v35, 2  ;;  %v140_v62 = vstv %s1038_s8  ;;  %s1540_s8 = sld [smem:[#allocation2 + $0x410]] }
  0x37   :  { %v122_v63 = vsel %vm106_vm5, %v118_v48, %v100_v49  ;;  %v123_v0 = vsel %vm107_vm6, %v118_v48, %v101_v50  ;;  %v124_v1 = vsel %vm108_vm7, %v118_v48, %v102_v51  ;;  %v133_v2 = vsel %vm125_vm8, %v132_v59, %v111_v52 }
  0x38   :  { %v134_v3 = vsel %vm126_vm9, %v132_v59, %v112_v53  ;;  %v135_v4 = vsel %vm127_vm10, %v132_v59, %v113_v54  ;;  %v136_v5 = vsel %vm128_vm11, %v132_v59, %v114_v55  ;;  %v137_v6 = vsel %vm129_vm12, %v132_v59, %v115_v56 }
  0x39   :  { %v138_v7 = vsel %vm130_vm13, %v132_v59, %v116_v57  ;;  %v141_v8 = vsel %vm125_vm8, %v140_v62, %v119_v58  ;;  %vm147_vm14 = vcmp.eq.s32.totalorder %v1007_v30, 3  ;;  %vm148_vm15 = vcmp.eq.s32.totalorder %v1009_v31, 3 }
  0x3a   :  { %vm149_vm0 = vcmp.eq.s32.totalorder %v1011_v32, 3  ;;  %vm150_vm1 = vcmp.eq.s32.totalorder %v1013_v33, 3  ;;  %vm151_vm2 = vcmp.eq.s32.totalorder %v1015_v34, 3  ;;  %v154_v9 = vstv %s1062_s9  ;;  %s1566_s9 = sld [smem:[#allocation2 + $0x11]] }
  0x3b   :  { %v142_v10 = vsel %vm126_vm9, %v140_v62, %v120_v60  ;;  %v143_v11 = vsel %vm127_vm10, %v140_v62, %v121_v61  ;;  %vm152_vm3 = vcmp.eq.s32.totalorder %v1017_v35, 3  ;;  %v162_v12 = vstv %s1072_s10  ;;  %s1576_s10 = sld [smem:[#allocation2 + $0x411]] }
  0x3c   :  { %v144_v13 = vsel %vm128_vm11, %v140_v62, %v122_v63  ;;  %v145_v14 = vsel %vm129_vm12, %v140_v62, %v123_v0  ;;  %v146_v15 = vsel %vm130_vm13, %v140_v62, %v124_v1  ;;  %v155_v16 = vsel %vm147_vm14, %v154_v9, %v133_v2 }
  0x3d   :  { %v156_v17 = vsel %vm148_vm15, %v154_v9, %v134_v3  ;;  %v157_v18 = vsel %vm149_vm0, %v154_v9, %v135_v4  ;;  %v158_v19 = vsel %vm150_vm1, %v154_v9, %v136_v5  ;;  %v159_v20 = vsel %vm151_vm2, %v154_v9, %v137_v6 }
  0x3e   :  { %v160_v21 = vsel %vm152_vm3, %v154_v9, %v138_v7  ;;  %v163_v22 = vsel %vm147_vm14, %v162_v12, %v141_v8  ;;  %vm169_vm4 = vcmp.eq.s32.totalorder %v1007_v30, 4  ;;  %vm170_vm5 = vcmp.eq.s32.totalorder %v1009_v31, 4 }
  0x3f   :  { %vm171_vm6 = vcmp.eq.s32.totalorder %v1011_v32, 4  ;;  %vm172_vm7 = vcmp.eq.s32.totalorder %v1013_v33, 4  ;;  %vm173_vm8 = vcmp.eq.s32.totalorder %v1015_v34, 4  ;;  %v176_v23 = vstv %s1098_s11  ;;  %s1602_s11 = sld [smem:[#allocation2 + $0x12]] }
  0x40   :  { %v164_v24 = vsel %vm148_vm15, %v162_v12, %v142_v10  ;;  %v165_v25 = vsel %vm149_vm0, %v162_v12, %v143_v11  ;;  %vm174_vm9 = vcmp.eq.s32.totalorder %v1017_v35, 4  ;;  %v184_v26 = vstv %s1108_s12  ;;  %s1612_s12 = sld [smem:[#allocation2 + $0x412]] }
  0x41   :  { %v166_v27 = vsel %vm150_vm1, %v162_v12, %v144_v13  ;;  %v167_v28 = vsel %vm151_vm2, %v162_v12, %v145_v14  ;;  %v168_v29 = vsel %vm152_vm3, %v162_v12, %v146_v15  ;;  %v177_v36 = vsel %vm169_vm4, %v176_v23, %v155_v16 }
  0x42   :  { %v178_v37 = vsel %vm170_vm5, %v176_v23, %v156_v17  ;;  %v179_v38 = vsel %vm171_vm6, %v176_v23, %v157_v18  ;;  %v180_v39 = vsel %vm172_vm7, %v176_v23, %v158_v19  ;;  %v181_v40 = vsel %vm173_vm8, %v176_v23, %v159_v20 }
  0x43   :  { %v182_v41 = vsel %vm174_vm9, %v176_v23, %v160_v21  ;;  %v185_v42 = vsel %vm169_vm4, %v184_v26, %v163_v22  ;;  %vm191_vm10 = vcmp.eq.s32.totalorder %v1007_v30, 5  ;;  %vm192_vm11 = vcmp.eq.s32.totalorder %v1009_v31, 5 }
  0x44   :  { %vm193_vm12 = vcmp.eq.s32.totalorder %v1011_v32, 5  ;;  %vm194_vm13 = vcmp.eq.s32.totalorder %v1013_v33, 5  ;;  %vm195_vm14 = vcmp.eq.s32.totalorder %v1015_v34, 5  ;;  %v198_v43 = vstv %s1134_s13  ;;  %s1638_s13 = sld [smem:[#allocation2 + $0x13]] }
  0x45   :  { %v186_v44 = vsel %vm170_vm5, %v184_v26, %v164_v24  ;;  %v187_v45 = vsel %vm171_vm6, %v184_v26, %v165_v25  ;;  %vm196_vm15 = vcmp.eq.s32.totalorder %v1017_v35, 5  ;;  %v206_v46 = vstv %s1144_s14  ;;  %s1648_s14 = sld [smem:[#allocation2 + $0x413]] }
  0x46   :  { %v188_v47 = vsel %vm172_vm7, %v184_v26, %v166_v27  ;;  %v189_v48 = vsel %vm173_vm8, %v184_v26, %v167_v28  ;;  %v190_v49 = vsel %vm174_vm9, %v184_v26, %v168_v29  ;;  %v199_v50 = vsel %vm191_vm10, %v198_v43, %v177_v36 }
  0x47   :  { %v200_v51 = vsel %vm192_vm11, %v198_v43, %v178_v37  ;;  %v201_v52 = vsel %vm193_vm12, %v198_v43, %v179_v38  ;;  %v202_v53 = vsel %vm194_vm13, %v198_v43, %v180_v39  ;;  %v203_v54 = vsel %vm195_vm14, %v198_v43, %v181_v40 }
  0x48   :  { %v204_v55 = vsel %vm196_vm15, %v198_v43, %v182_v41  ;;  %v207_v56 = vsel %vm191_vm10, %v206_v46, %v185_v42  ;;  %vm213_vm0 = vcmp.eq.s32.totalorder %v1007_v30, 6  ;;  %vm214_vm1 = vcmp.eq.s32.totalorder %v1009_v31, 6 }
  0x49   :  { %vm215_vm2 = vcmp.eq.s32.totalorder %v1011_v32, 6  ;;  %vm216_vm3 = vcmp.eq.s32.totalorder %v1013_v33, 6  ;;  %vm217_vm4 = vcmp.eq.s32.totalorder %v1015_v34, 6  ;;  %v220_v57 = vstv %s1170_s15  ;;  %s1674_s15 = sld [smem:[#allocation2 + $0x14]] }
  0x4a   :  { %v208_v58 = vsel %vm192_vm11, %v206_v46, %v186_v44  ;;  %v209_v59 = vsel %vm193_vm12, %v206_v46, %v187_v45  ;;  %vm218_vm5 = vcmp.eq.s32.totalorder %v1017_v35, 6  ;;  %v228_v60 = vstv %s1180_s16  ;;  %s1684_s16 = sld [smem:[#allocation2 + $0x414]] }
  0x4b   :  { %v210_v61 = vsel %vm194_vm13, %v206_v46, %v188_v47  ;;  %v211_v62 = vsel %vm195_vm14, %v206_v46, %v189_v48  ;;  %v212_v63 = vsel %vm196_vm15, %v206_v46, %v190_v49  ;;  %v221_v0 = vsel %vm213_vm0, %v220_v57, %v199_v50 }
  0x4c   :  { %v222_v1 = vsel %vm214_vm1, %v220_v57, %v200_v51  ;;  %v223_v2 = vsel %vm215_vm2, %v220_v57, %v201_v52  ;;  %v224_v3 = vsel %vm216_vm3, %v220_v57, %v202_v53  ;;  %v225_v4 = vsel %vm217_vm4, %v220_v57, %v203_v54 }
  0x4d   :  { %v226_v5 = vsel %vm218_vm5, %v220_v57, %v204_v55  ;;  %v229_v6 = vsel %vm213_vm0, %v228_v60, %v207_v56  ;;  %vm235_vm6 = vcmp.eq.s32.totalorder %v1007_v30, 7  ;;  %vm236_vm7 = vcmp.eq.s32.totalorder %v1009_v31, 7 }
  0x4e   :  { %vm237_vm8 = vcmp.eq.s32.totalorder %v1011_v32, 7  ;;  %vm238_vm9 = vcmp.eq.s32.totalorder %v1013_v33, 7  ;;  %vm239_vm10 = vcmp.eq.s32.totalorder %v1015_v34, 7  ;;  %v242_v7 = vstv %s1206_s19  ;;  %s1710_s19 = sld [smem:[#allocation2 + $0x15]] }
  0x4f   :  { %v230_v8 = vsel %vm214_vm1, %v228_v60, %v208_v58  ;;  %v231_v9 = vsel %vm215_vm2, %v228_v60, %v209_v59  ;;  %vm240_vm11 = vcmp.eq.s32.totalorder %v1017_v35, 7  ;;  %v250_v10 = vstv %s1216_s20  ;;  %s1720_s20 = sld [smem:[#allocation2 + $0x415]] }
  0x50   :  { %v232_v11 = vsel %vm216_vm3, %v228_v60, %v210_v61  ;;  %v233_v12 = vsel %vm217_vm4, %v228_v60, %v211_v62  ;;  %v234_v13 = vsel %vm218_vm5, %v228_v60, %v212_v63  ;;  %v243_v14 = vsel %vm235_vm6, %v242_v7, %v221_v0 }
  0x51   :  { %v244_v15 = vsel %vm236_vm7, %v242_v7, %v222_v1  ;;  %v245_v16 = vsel %vm237_vm8, %v242_v7, %v223_v2  ;;  %v246_v17 = vsel %vm238_vm9, %v242_v7, %v224_v3  ;;  %v247_v18 = vsel %vm239_vm10, %v242_v7, %v225_v4 }
  0x52   :  { %v248_v19 = vsel %vm240_vm11, %v242_v7, %v226_v5  ;;  %v251_v20 = vsel %vm235_vm6, %v250_v10, %v229_v6  ;;  %vm257_vm12 = vcmp.eq.s32.totalorder %v1007_v30, 8  ;;  %vm258_vm13 = vcmp.eq.s32.totalorder %v1009_v31, 8 }
  0x53   :  { %vm259_vm14 = vcmp.eq.s32.totalorder %v1011_v32, 8  ;;  %vm260_vm15 = vcmp.eq.s32.totalorder %v1013_v33, 8  ;;  %vm261_vm0 = vcmp.eq.s32.totalorder %v1015_v34, 8  ;;  %v264_v21 = vstv %s1242_s21  ;;  %s1746_s21 = sld [smem:[#allocation2 + $0x16]] }
  0x54   :  { %v252_v22 = vsel %vm236_vm7, %v250_v10, %v230_v8  ;;  %v253_v23 = vsel %vm237_vm8, %v250_v10, %v231_v9  ;;  %vm262_vm1 = vcmp.eq.s32.totalorder %v1017_v35, 8  ;;  %v272_v24 = vstv %s1252_s22  ;;  %s1756_s22 = sld [smem:[#allocation2 + $0x416]] }
  0x55   :  { %v254_v25 = vsel %vm238_vm9, %v250_v10, %v232_v11  ;;  %v255_v26 = vsel %vm239_vm10, %v250_v10, %v233_v12  ;;  %v256_v27 = vsel %vm240_vm11, %v250_v10, %v234_v13  ;;  %v265_v28 = vsel %vm257_vm12, %v264_v21, %v243_v14 }
  0x56   :  { %v266_v29 = vsel %vm258_vm13, %v264_v21, %v244_v15  ;;  %v267_v36 = vsel %vm259_vm14, %v264_v21, %v245_v16  ;;  %v268_v37 = vsel %vm260_vm15, %v264_v21, %v246_v17  ;;  %v269_v38 = vsel %vm261_vm0, %v264_v21, %v247_v18 }
  0x57   :  { %v270_v39 = vsel %vm262_vm1, %v264_v21, %v248_v19  ;;  %v273_v40 = vsel %vm257_vm12, %v272_v24, %v251_v20  ;;  %vm279_vm2 = vcmp.eq.s32.totalorder %v1007_v30, 9  ;;  %vm280_vm3 = vcmp.eq.s32.totalorder %v1009_v31, 9 }
  0x58   :  { %vm281_vm4 = vcmp.eq.s32.totalorder %v1011_v32, 9  ;;  %vm282_vm5 = vcmp.eq.s32.totalorder %v1013_v33, 9  ;;  %vm283_vm6 = vcmp.eq.s32.totalorder %v1015_v34, 9  ;;  %v286_v41 = vstv %s1278_s23  ;;  %s1782_s23 = sld [smem:[#allocation2 + $0x17]] }
  0x59   :  { %v274_v42 = vsel %vm258_vm13, %v272_v24, %v252_v22  ;;  %v275_v43 = vsel %vm259_vm14, %v272_v24, %v253_v23  ;;  %vm284_vm7 = vcmp.eq.s32.totalorder %v1017_v35, 9  ;;  %v294_v44 = vstv %s1288_s24  ;;  %s1792_s24 = sld [smem:[#allocation2 + $0x417]] }
  0x5a   :  { %v276_v45 = vsel %vm260_vm15, %v272_v24, %v254_v25  ;;  %v277_v46 = vsel %vm261_vm0, %v272_v24, %v255_v26  ;;  %v278_v47 = vsel %vm262_vm1, %v272_v24, %v256_v27  ;;  %v287_v48 = vsel %vm279_vm2, %v286_v41, %v265_v28 }
  0x5b   :  { %v288_v49 = vsel %vm280_vm3, %v286_v41, %v266_v29  ;;  %v289_v50 = vsel %vm281_vm4, %v286_v41, %v267_v36  ;;  %v290_v51 = vsel %vm282_vm5, %v286_v41, %v268_v37  ;;  %v291_v52 = vsel %vm283_vm6, %v286_v41, %v269_v38 }
  0x5c   :  { %v292_v53 = vsel %vm284_vm7, %v286_v41, %v270_v39  ;;  %v295_v54 = vsel %vm279_vm2, %v294_v44, %v273_v40  ;;  %vm301_vm8 = vcmp.eq.s32.totalorder %v1007_v30, 10  ;;  %vm302_vm9 = vcmp.eq.s32.totalorder %v1009_v31, 10 }
  0x5d   :  { %vm303_vm10 = vcmp.eq.s32.totalorder %v1011_v32, 10  ;;  %vm304_vm11 = vcmp.eq.s32.totalorder %v1013_v33, 10  ;;  %vm305_vm12 = vcmp.eq.s32.totalorder %v1015_v34, 10  ;;  %v308_v55 = vstv %s1314_s25  ;;  %s1818_s25 = sld [smem:[#allocation2 + $0x18]] }
  0x5e   :  { %v296_v56 = vsel %vm280_vm3, %v294_v44, %v274_v42  ;;  %v297_v57 = vsel %vm281_vm4, %v294_v44, %v275_v43  ;;  %vm306_vm13 = vcmp.eq.s32.totalorder %v1017_v35, 10  ;;  %v316_v58 = vstv %s1324_s26  ;;  %s1828_s26 = sld [smem:[#allocation2 + $0x418]] }
  0x5f   :  { %v298_v59 = vsel %vm282_vm5, %v294_v44, %v276_v45  ;;  %v299_v60 = vsel %vm283_vm6, %v294_v44, %v277_v46  ;;  %v300_v61 = vsel %vm284_vm7, %v294_v44, %v278_v47  ;;  %v309_v62 = vsel %vm301_vm8, %v308_v55, %v287_v48 }
  0x60   :  { %v310_v63 = vsel %vm302_vm9, %v308_v55, %v288_v49  ;;  %v311_v0 = vsel %vm303_vm10, %v308_v55, %v289_v50  ;;  %v312_v1 = vsel %vm304_vm11, %v308_v55, %v290_v51  ;;  %v313_v2 = vsel %vm305_vm12, %v308_v55, %v291_v52 }
  0x61   :  { %v314_v3 = vsel %vm306_vm13, %v308_v55, %v292_v53  ;;  %v317_v4 = vsel %vm301_vm8, %v316_v58, %v295_v54  ;;  %vm323_vm14 = vcmp.eq.s32.totalorder %v1007_v30, 11  ;;  %vm324_vm15 = vcmp.eq.s32.totalorder %v1009_v31, 11 }
  0x62   :  { %vm325_vm0 = vcmp.eq.s32.totalorder %v1011_v32, 11  ;;  %vm326_vm1 = vcmp.eq.s32.totalorder %v1013_v33, 11  ;;  %vm327_vm2 = vcmp.eq.s32.totalorder %v1015_v34, 11  ;;  %v330_v5 = vstv %s1350_s27  ;;  %s1854_s27 = sld [smem:[#allocation2 + $0x19]] }
  0x63   :  { %v318_v6 = vsel %vm302_vm9, %v316_v58, %v296_v56  ;;  %v319_v7 = vsel %vm303_vm10, %v316_v58, %v297_v57  ;;  %vm328_vm3 = vcmp.eq.s32.totalorder %v1017_v35, 11  ;;  %v338_v8 = vstv %s1360_s28  ;;  %s1864_s28 = sld [smem:[#allocation2 + $0x419]] }
  0x64   :  { %v320_v9 = vsel %vm304_vm11, %v316_v58, %v298_v59  ;;  %v321_v10 = vsel %vm305_vm12, %v316_v58, %v299_v60  ;;  %v322_v11 = vsel %vm306_vm13, %v316_v58, %v300_v61  ;;  %v331_v12 = vsel %vm323_vm14, %v330_v5, %v309_v62 }
  0x65   :  { %v332_v13 = vsel %vm324_vm15, %v330_v5, %v310_v63  ;;  %v333_v14 = vsel %vm325_vm0, %v330_v5, %v311_v0  ;;  %v334_v15 = vsel %vm326_vm1, %v330_v5, %v312_v1  ;;  %v335_v16 = vsel %vm327_vm2, %v330_v5, %v313_v2 }
  0x66   :  { %v336_v17 = vsel %vm328_vm3, %v330_v5, %v314_v3  ;;  %v339_v18 = vsel %vm323_vm14, %v338_v8, %v317_v4  ;;  %vm345_vm4 = vcmp.eq.s32.totalorder %v1007_v30, 12  ;;  %vm346_vm5 = vcmp.eq.s32.totalorder %v1009_v31, 12 }
  0x67   :  { %vm347_vm6 = vcmp.eq.s32.totalorder %v1011_v32, 12  ;;  %vm348_vm7 = vcmp.eq.s32.totalorder %v1013_v33, 12  ;;  %vm349_vm8 = vcmp.eq.s32.totalorder %v1015_v34, 12  ;;  %v352_v19 = vstv %s1386_s29  ;;  %s1890_s29 = sld [smem:[#allocation2 + $0x1a]] }
  0x68   :  { %v340_v20 = vsel %vm324_vm15, %v338_v8, %v318_v6  ;;  %v341_v21 = vsel %vm325_vm0, %v338_v8, %v319_v7  ;;  %vm350_vm9 = vcmp.eq.s32.totalorder %v1017_v35, 12  ;;  %v360_v22 = vstv %s1396_s30  ;;  %s1900_s30 = sld [smem:[#allocation2 + $0x41a]] }
  0x69   :  { %v342_v23 = vsel %vm326_vm1, %v338_v8, %v320_v9  ;;  %v343_v24 = vsel %vm327_vm2, %v338_v8, %v321_v10  ;;  %v344_v25 = vsel %vm328_vm3, %v338_v8, %v322_v11  ;;  %v353_v26 = vsel %vm345_vm4, %v352_v19, %v331_v12 }
  0x6a   :  { %v354_v27 = vsel %vm346_vm5, %v352_v19, %v332_v13  ;;  %v355_v28 = vsel %vm347_vm6, %v352_v19, %v333_v14  ;;  %v356_v29 = vsel %vm348_vm7, %v352_v19, %v334_v15  ;;  %v357_v36 = vsel %vm349_vm8, %v352_v19, %v335_v16 }
  0x6b   :  { %v358_v37 = vsel %vm350_vm9, %v352_v19, %v336_v17  ;;  %v361_v38 = vsel %vm345_vm4, %v360_v22, %v339_v18  ;;  %vm367_vm10 = vcmp.eq.s32.totalorder %v1007_v30, 13  ;;  %vm368_vm11 = vcmp.eq.s32.totalorder %v1009_v31, 13 }
  0x6c   :  { %vm369_vm12 = vcmp.eq.s32.totalorder %v1011_v32, 13  ;;  %vm370_vm13 = vcmp.eq.s32.totalorder %v1013_v33, 13  ;;  %vm371_vm14 = vcmp.eq.s32.totalorder %v1015_v34, 13  ;;  %v374_v39 = vstv %s1422_s0  ;;  %s1926_s0 = sld [smem:[#allocation2 + $0x1b]] }
  0x6d   :  { %v362_v40 = vsel %vm346_vm5, %v360_v22, %v340_v20  ;;  %v363_v41 = vsel %vm347_vm6, %v360_v22, %v341_v21  ;;  %vm372_vm15 = vcmp.eq.s32.totalorder %v1017_v35, 13  ;;  %v382_v42 = vstv %s1432_s3  ;;  %s1936_s3 = sld [smem:[#allocation2 + $0x41b]] }
  0x6e   :  { %v364_v43 = vsel %vm348_vm7, %v360_v22, %v342_v23  ;;  %v365_v44 = vsel %vm349_vm8, %v360_v22, %v343_v24  ;;  %v366_v45 = vsel %vm350_vm9, %v360_v22, %v344_v25  ;;  %v375_v46 = vsel %vm367_vm10, %v374_v39, %v353_v26 }
  0x6f   :  { %v376_v47 = vsel %vm368_vm11, %v374_v39, %v354_v27  ;;  %v377_v48 = vsel %vm369_vm12, %v374_v39, %v355_v28  ;;  %v378_v49 = vsel %vm370_vm13, %v374_v39, %v356_v29  ;;  %v379_v50 = vsel %vm371_vm14, %v374_v39, %v357_v36 }
  0x70   :  { %v380_v51 = vsel %vm372_vm15, %v374_v39, %v358_v37  ;;  %v383_v52 = vsel %vm367_vm10, %v382_v42, %v361_v38  ;;  %vm389_vm0 = vcmp.eq.s32.totalorder %v1007_v30, 14  ;;  %vm390_vm1 = vcmp.eq.s32.totalorder %v1009_v31, 14 }
  0x71   :  { %vm391_vm2 = vcmp.eq.s32.totalorder %v1011_v32, 14  ;;  %vm392_vm3 = vcmp.eq.s32.totalorder %v1013_v33, 14  ;;  %vm393_vm4 = vcmp.eq.s32.totalorder %v1015_v34, 14  ;;  %v396_v53 = vstv %s1458_s1  ;;  %s1962_s1 = sld [smem:[#allocation2 + $0x1c]] }
  0x72   :  { %v384_v54 = vsel %vm368_vm11, %v382_v42, %v362_v40  ;;  %v385_v55 = vsel %vm369_vm12, %v382_v42, %v363_v41  ;;  %vm394_vm5 = vcmp.eq.s32.totalorder %v1017_v35, 14  ;;  %v404_v56 = vstv %s1468_s4  ;;  %s1972_s4 = sld [smem:[#allocation2 + $0x41c]] }
  0x73   :  { %v386_v57 = vsel %vm370_vm13, %v382_v42, %v364_v43  ;;  %v387_v58 = vsel %vm371_vm14, %v382_v42, %v365_v44  ;;  %v388_v59 = vsel %vm372_vm15, %v382_v42, %v366_v45  ;;  %v397_v60 = vsel %vm389_vm0, %v396_v53, %v375_v46 }
  0x74   :  { %v398_v61 = vsel %vm390_vm1, %v396_v53, %v376_v47  ;;  %v399_v62 = vsel %vm391_vm2, %v396_v53, %v377_v48  ;;  %v400_v63 = vsel %vm392_vm3, %v396_v53, %v378_v49  ;;  %v401_v0 = vsel %vm393_vm4, %v396_v53, %v379_v50 }
  0x75   :  { %v402_v1 = vsel %vm394_vm5, %v396_v53, %v380_v51  ;;  %v405_v2 = vsel %vm389_vm0, %v404_v56, %v383_v52  ;;  %vm411_vm6 = vcmp.eq.s32.totalorder %v1007_v30, 15  ;;  %vm412_vm7 = vcmp.eq.s32.totalorder %v1009_v31, 15 }
  0x76   :  { %vm413_vm8 = vcmp.eq.s32.totalorder %v1011_v32, 15  ;;  %vm414_vm9 = vcmp.eq.s32.totalorder %v1013_v33, 15  ;;  %vm415_vm10 = vcmp.eq.s32.totalorder %v1015_v34, 15  ;;  %v418_v3 = vstv %s1494_s5  ;;  %s1998_s5 = sld [smem:[#allocation2 + $0x1d]] }
  0x77   :  { %v406_v4 = vsel %vm390_vm1, %v404_v56, %v384_v54  ;;  %v407_v5 = vsel %vm391_vm2, %v404_v56, %v385_v55  ;;  %vm416_vm11 = vcmp.eq.s32.totalorder %v1017_v35, 15  ;;  %v426_v6 = vstv %s1504_s6  ;;  %s2014_s6 = sld [smem:[#allocation2 + $0x41d]] }
  0x78   :  { %v408_v7 = vsel %vm392_vm3, %v404_v56, %v386_v57  ;;  %v409_v8 = vsel %vm393_vm4, %v404_v56, %v387_v58  ;;  %v410_v9 = vsel %vm394_vm5, %v404_v56, %v388_v59  ;;  %v419_v10 = vsel %vm411_vm6, %v418_v3, %v397_v60 }
  0x79   :  { %v420_v11 = vsel %vm412_vm7, %v418_v3, %v398_v61  ;;  %v421_v12 = vsel %vm413_vm8, %v418_v3, %v399_v62  ;;  %v422_v13 = vsel %vm414_vm9, %v418_v3, %v400_v63  ;;  %v423_v14 = vsel %vm415_vm10, %v418_v3, %v401_v0 }
  0x7a   :  { %v424_v15 = vsel %vm416_vm11, %v418_v3, %v402_v1  ;;  %v427_v16 = vsel %vm411_vm6, %v426_v6, %v405_v2  ;;  %vm433_vm12 = vcmp.eq.s32.totalorder %v1007_v30, 16  ;;  %vm434_vm13 = vcmp.eq.s32.totalorder %v1009_v31, 16 }
  0x7b   :  { %vm435_vm14 = vcmp.eq.s32.totalorder %v1011_v32, 16  ;;  %vm436_vm15 = vcmp.eq.s32.totalorder %v1013_v33, 16  ;;  %vm437_vm0 = vcmp.eq.s32.totalorder %v1015_v34, 16  ;;  %v440_v17 = vstv %s1530_s7  ;;  %s959_s7 = smov [#allocation7]  }
  0x7c   :  { %v428_v18 = vsel %vm412_vm7, %v426_v6, %v406_v4  ;;  %v429_v19 = vsel %vm413_vm8, %v426_v6, %v407_v5  ;;  %vm438_vm1 = vcmp.eq.s32.totalorder %v1017_v35, 16  ;;  %v448_v20 = vstv %s1540_s8  ;;  %s800_s8 = sshll.u32 %s959_s7, 4  ;;  %s801_s8 = int_to_ptr.vmem [resolvable:$true] %s800_s8 }
  0x7d   :  { %v430_v21 = vsel %vm414_vm9, %v426_v6, %v408_v7  ;;  %v431_v22 = vsel %vm415_vm10, %v426_v6, %v409_v8  ;;  %v432_v23 = vsel %vm416_vm11, %v426_v6, %v410_v9  ;;  %v441_v24 = vsel %vm433_vm12, %v440_v17, %v419_v10  ;;  %p932_p12 = scmp.lt.s32.totalorder %s801_s8, %s801_s8 }
  0x7e   :  { %v442_v25 = vsel %vm434_vm13, %v440_v17, %v420_v11  ;;  %v443_v26 = vsel %vm435_vm14, %v440_v17, %v421_v12  ;;  %v444_v27 = vsel %vm436_vm15, %v440_v17, %v422_v13  ;;  %v445_v28 = vsel %vm437_vm0, %v440_v17, %v423_v14 }
  0x7f   :  { %v446_v29 = vsel %vm438_vm1, %v440_v17, %v424_v15  ;;  %v449_v36 = vsel %vm433_vm12, %v448_v20, %v427_v16  ;;  %vm455_vm2 = vcmp.eq.s32.totalorder %v1007_v30, 17  ;;  %vm456_vm3 = vcmp.eq.s32.totalorder %v1009_v31, 17 }
  0x80   :  { %vm457_vm4 = vcmp.eq.s32.totalorder %v1011_v32, 17  ;;  %vm458_vm5 = vcmp.eq.s32.totalorder %v1013_v33, 17  ;;  %vm459_vm6 = vcmp.eq.s32.totalorder %v1015_v34, 17  ;;  %v462_v37 = vstv %s1566_s9  ;;  %s927_s9 = scalar_lea.vmem %s801_s8, 768 }
  0x81   :  { %v450_v38 = vsel %vm434_vm13, %v448_v20, %v428_v18  ;;  %v451_v39 = vsel %vm435_vm14, %v448_v20, %v429_v19  ;;  %vm460_vm7 = vcmp.eq.s32.totalorder %v1017_v35, 17  ;;  %v470_v40 = vstv %s1576_s10  ;;  %p928_p11 = scmp.ne.s32.totalorder %s801_s8, %s927_s9  ;;  %p933_p13 = scmp.lt.s32.totalorder %s927_s9, %s927_s9 }
  0x82   :  { %v452_v41 = vsel %vm436_vm15, %v448_v20, %v430_v21  ;;  %v453_v42 = vsel %vm437_vm0, %v448_v20, %v431_v22  ;;  %v454_v43 = vsel %vm438_vm1, %v448_v20, %v432_v23  ;;  %v463_v44 = vsel %vm455_vm2, %v462_v37, %v441_v24 }
  0x83   :  { %v464_v45 = vsel %vm456_vm3, %v462_v37, %v442_v25  ;;  %v465_v46 = vsel %vm457_vm4, %v462_v37, %v443_v26  ;;  %v466_v47 = vsel %vm458_vm5, %v462_v37, %v444_v27  ;;  %v467_v48 = vsel %vm459_vm6, %v462_v37, %v445_v28  ;;  %p934_p0 = por %p933_p13, %p932_p12 }
  0x84   :  { %v468_v49 = vsel %vm460_vm7, %v462_v37, %v446_v29  ;;  %v471_v50 = vsel %vm455_vm2, %v470_v40, %v449_v36  ;;  %vm477_vm8 = vcmp.eq.s32.totalorder %v1007_v30, 18  ;;  %vm478_vm9 = vcmp.eq.s32.totalorder %v1009_v31, 18 }
  0x85   :  { %vm479_vm10 = vcmp.eq.s32.totalorder %v1011_v32, 18  ;;  %vm480_vm11 = vcmp.eq.s32.totalorder %v1013_v33, 18  ;;  %vm481_vm12 = vcmp.eq.s32.totalorder %v1015_v34, 18  ;;  %v484_v51 = vstv %s1602_s11  ;;  %p935_p1 = pnand %p934_p0, %p928_p11 }
  0x86   :  { %v472_v52 = vsel %vm456_vm3, %v470_v40, %v450_v38  ;;  %v473_v53 = vsel %vm457_vm4, %v470_v40, %v451_v39  ;;  %vm482_vm13 = vcmp.eq.s32.totalorder %v1017_v35, 18  ;;  %v492_v54 = vstv %s1612_s12 }
  0x87   :  { %v474_v55 = vsel %vm458_vm5, %v470_v40, %v452_v41  ;;  %v475_v56 = vsel %vm459_vm6, %v470_v40, %v453_v42  ;;  %v476_v57 = vsel %vm460_vm7, %v470_v40, %v454_v43  ;;  %v485_v58 = vsel %vm477_vm8, %v484_v51, %v463_v44 }
  0x88   :  { %v486_v59 = vsel %vm478_vm9, %v484_v51, %v464_v45  ;;  %v487_v60 = vsel %vm479_vm10, %v484_v51, %v465_v46  ;;  %v488_v61 = vsel %vm480_vm11, %v484_v51, %v466_v47  ;;  %v489_v62 = vsel %vm481_vm12, %v484_v51, %v467_v48 }
  0x89   :  { %v490_v63 = vsel %vm482_vm13, %v484_v51, %v468_v49  ;;  %v493_v0 = vsel %vm477_vm8, %v492_v54, %v471_v50  ;;  %vm499_vm14 = vcmp.eq.s32.totalorder %v1007_v30, 19  ;;  %vm500_vm15 = vcmp.eq.s32.totalorder %v1009_v31, 19 }
  0x8a   :  { %vm501_vm0 = vcmp.eq.s32.totalorder %v1011_v32, 19  ;;  %vm502_vm1 = vcmp.eq.s32.totalorder %v1013_v33, 19  ;;  %vm503_vm2 = vcmp.eq.s32.totalorder %v1015_v34, 19  ;;  %v506_v1 = vstv %s1638_s13 }
  0x8b   :  { %v494_v2 = vsel %vm478_vm9, %v492_v54, %v472_v52  ;;  %v495_v3 = vsel %vm479_vm10, %v492_v54, %v473_v53  ;;  %vm504_vm3 = vcmp.eq.s32.totalorder %v1017_v35, 19  ;;  %v514_v4 = vstv %s1648_s14 }
  0x8c   :  { %v496_v5 = vsel %vm480_vm11, %v492_v54, %v474_v55  ;;  %v497_v6 = vsel %vm481_vm12, %v492_v54, %v475_v56  ;;  %v498_v7 = vsel %vm482_vm13, %v492_v54, %v476_v57  ;;  %v507_v8 = vsel %vm499_vm14, %v506_v1, %v485_v58 }
  0x8d   :  { %v508_v9 = vsel %vm500_vm15, %v506_v1, %v486_v59  ;;  %v509_v10 = vsel %vm501_vm0, %v506_v1, %v487_v60  ;;  %v510_v11 = vsel %vm502_vm1, %v506_v1, %v488_v61  ;;  %v511_v12 = vsel %vm503_vm2, %v506_v1, %v489_v62 }
  0x8e   :  { %v512_v13 = vsel %vm504_vm3, %v506_v1, %v490_v63  ;;  %v515_v14 = vsel %vm499_vm14, %v514_v4, %v493_v0  ;;  %vm521_vm4 = vcmp.eq.s32.totalorder %v1007_v30, 20  ;;  %vm522_vm5 = vcmp.eq.s32.totalorder %v1009_v31, 20 }
  0x8f   :  { %vm523_vm6 = vcmp.eq.s32.totalorder %v1011_v32, 20  ;;  %vm524_vm7 = vcmp.eq.s32.totalorder %v1013_v33, 20  ;;  %vm525_vm8 = vcmp.eq.s32.totalorder %v1015_v34, 20  ;;  %v528_v15 = vstv %s1674_s15 }
  0x90   :  { %v516_v16 = vsel %vm500_vm15, %v514_v4, %v494_v2  ;;  %v517_v17 = vsel %vm501_vm0, %v514_v4, %v495_v3  ;;  %vm526_vm9 = vcmp.eq.s32.totalorder %v1017_v35, 20  ;;  %v536_v18 = vstv %s1684_s16 }
  0x91   :  { %v518_v19 = vsel %vm502_vm1, %v514_v4, %v496_v5  ;;  %v519_v20 = vsel %vm503_vm2, %v514_v4, %v497_v6  ;;  %v520_v21 = vsel %vm504_vm3, %v514_v4, %v498_v7  ;;  %v529_v22 = vsel %vm521_vm4, %v528_v15, %v507_v8 }
  0x92   :  { %v530_v23 = vsel %vm522_vm5, %v528_v15, %v508_v9  ;;  %v531_v24 = vsel %vm523_vm6, %v528_v15, %v509_v10  ;;  %v532_v25 = vsel %vm524_vm7, %v528_v15, %v510_v11  ;;  %v533_v26 = vsel %vm525_vm8, %v528_v15, %v511_v12 }
  0x93   :  { %v534_v27 = vsel %vm526_vm9, %v528_v15, %v512_v13  ;;  %v537_v28 = vsel %vm521_vm4, %v536_v18, %v515_v14  ;;  %vm543_vm10 = vcmp.eq.s32.totalorder %v1007_v30, 21  ;;  %vm544_vm11 = vcmp.eq.s32.totalorder %v1009_v31, 21 }
  0x94   :  { %vm545_vm12 = vcmp.eq.s32.totalorder %v1011_v32, 21  ;;  %vm546_vm13 = vcmp.eq.s32.totalorder %v1013_v33, 21  ;;  %vm547_vm14 = vcmp.eq.s32.totalorder %v1015_v34, 21  ;;  %v550_v29 = vstv %s1710_s19 }
  0x95   :  { %v538_v36 = vsel %vm522_vm5, %v536_v18, %v516_v16  ;;  %v539_v37 = vsel %vm523_vm6, %v536_v18, %v517_v17  ;;  %vm548_vm15 = vcmp.eq.s32.totalorder %v1017_v35, 21  ;;  %v558_v38 = vstv %s1720_s20 }
  0x96   :  { %v540_v39 = vsel %vm524_vm7, %v536_v18, %v518_v19  ;;  %v541_v40 = vsel %vm525_vm8, %v536_v18, %v519_v20  ;;  %v542_v41 = vsel %vm526_vm9, %v536_v18, %v520_v21  ;;  %v551_v42 = vsel %vm543_vm10, %v550_v29, %v529_v22 }
  0x97   :  { %v552_v43 = vsel %vm544_vm11, %v550_v29, %v530_v23  ;;  %v553_v44 = vsel %vm545_vm12, %v550_v29, %v531_v24  ;;  %v554_v45 = vsel %vm546_vm13, %v550_v29, %v532_v25  ;;  %v555_v46 = vsel %vm547_vm14, %v550_v29, %v533_v26 }
  0x98   :  { %v556_v47 = vsel %vm548_vm15, %v550_v29, %v534_v27  ;;  %v559_v48 = vsel %vm543_vm10, %v558_v38, %v537_v28  ;;  %vm565_vm0 = vcmp.eq.s32.totalorder %v1007_v30, 22  ;;  %vm566_vm1 = vcmp.eq.s32.totalorder %v1009_v31, 22 }
  0x99   :  { %vm567_vm2 = vcmp.eq.s32.totalorder %v1011_v32, 22  ;;  %vm568_vm3 = vcmp.eq.s32.totalorder %v1013_v33, 22  ;;  %vm569_vm4 = vcmp.eq.s32.totalorder %v1015_v34, 22  ;;  %v572_v49 = vstv %s1746_s21 }
  0x9a   :  { %v560_v50 = vsel %vm544_vm11, %v558_v38, %v538_v36  ;;  %v561_v51 = vsel %vm545_vm12, %v558_v38, %v539_v37  ;;  %vm570_vm5 = vcmp.eq.s32.totalorder %v1017_v35, 22  ;;  %v580_v52 = vstv %s1756_s22 }
  0x9b   :  { %v562_v53 = vsel %vm546_vm13, %v558_v38, %v540_v39  ;;  %v563_v54 = vsel %vm547_vm14, %v558_v38, %v541_v40  ;;  %v564_v55 = vsel %vm548_vm15, %v558_v38, %v542_v41  ;;  %v573_v56 = vsel %vm565_vm0, %v572_v49, %v551_v42 }
  0x9c   :  { %v574_v57 = vsel %vm566_vm1, %v572_v49, %v552_v43  ;;  %v575_v58 = vsel %vm567_vm2, %v572_v49, %v553_v44  ;;  %v576_v59 = vsel %vm568_vm3, %v572_v49, %v554_v45  ;;  %v577_v60 = vsel %vm569_vm4, %v572_v49, %v555_v46 }
  0x9d   :  { %v578_v61 = vsel %vm570_vm5, %v572_v49, %v556_v47  ;;  %v581_v62 = vsel %vm565_vm0, %v580_v52, %v559_v48  ;;  %vm587_vm6 = vcmp.eq.s32.totalorder %v1007_v30, 23  ;;  %vm588_vm7 = vcmp.eq.s32.totalorder %v1009_v31, 23 }
  0x9e   :  { %vm589_vm8 = vcmp.eq.s32.totalorder %v1011_v32, 23  ;;  %vm590_vm9 = vcmp.eq.s32.totalorder %v1013_v33, 23  ;;  %vm591_vm10 = vcmp.eq.s32.totalorder %v1015_v34, 23  ;;  %v594_v63 = vstv %s1782_s23 }
  0x9f   :  { %v582_v0 = vsel %vm566_vm1, %v580_v52, %v560_v50  ;;  %v583_v1 = vsel %vm567_vm2, %v580_v52, %v561_v51  ;;  %vm592_vm11 = vcmp.eq.s32.totalorder %v1017_v35, 23  ;;  %v602_v2 = vstv %s1792_s24 }
  0xa0   :  { %v584_v3 = vsel %vm568_vm3, %v580_v52, %v562_v53  ;;  %v585_v4 = vsel %vm569_vm4, %v580_v52, %v563_v54  ;;  %v586_v5 = vsel %vm570_vm5, %v580_v52, %v564_v55  ;;  %v595_v6 = vsel %vm587_vm6, %v594_v63, %v573_v56 }
  0xa1   :  { %v596_v7 = vsel %vm588_vm7, %v594_v63, %v574_v57  ;;  %v597_v8 = vsel %vm589_vm8, %v594_v63, %v575_v58  ;;  %v598_v9 = vsel %vm590_vm9, %v594_v63, %v576_v59  ;;  %v599_v10 = vsel %vm591_vm10, %v594_v63, %v577_v60 }
  0xa2   :  { %v600_v11 = vsel %vm592_vm11, %v594_v63, %v578_v61  ;;  %v603_v12 = vsel %vm587_vm6, %v602_v2, %v581_v62  ;;  %vm609_vm12 = vcmp.eq.s32.totalorder %v1007_v30, 24  ;;  %vm610_vm13 = vcmp.eq.s32.totalorder %v1009_v31, 24 }
  0xa3   :  { %vm611_vm14 = vcmp.eq.s32.totalorder %v1011_v32, 24  ;;  %vm612_vm15 = vcmp.eq.s32.totalorder %v1013_v33, 24  ;;  %vm613_vm0 = vcmp.eq.s32.totalorder %v1015_v34, 24  ;;  %v616_v13 = vstv %s1818_s25 }
  0xa4   :  { %v604_v14 = vsel %vm588_vm7, %v602_v2, %v582_v0  ;;  %v605_v15 = vsel %vm589_vm8, %v602_v2, %v583_v1  ;;  %vm614_vm1 = vcmp.eq.s32.totalorder %v1017_v35, 24  ;;  %v624_v16 = vstv %s1828_s26 }
  0xa5   :  { %v606_v17 = vsel %vm590_vm9, %v602_v2, %v584_v3  ;;  %v607_v18 = vsel %vm591_vm10, %v602_v2, %v585_v4  ;;  %v608_v19 = vsel %vm592_vm11, %v602_v2, %v586_v5  ;;  %v617_v20 = vsel %vm609_vm12, %v616_v13, %v595_v6 }
  0xa6   :  { %v618_v21 = vsel %vm610_vm13, %v616_v13, %v596_v7  ;;  %v619_v22 = vsel %vm611_vm14, %v616_v13, %v597_v8  ;;  %v620_v23 = vsel %vm612_vm15, %v616_v13, %v598_v9  ;;  %v621_v24 = vsel %vm613_vm0, %v616_v13, %v599_v10 }
  0xa7   :  { %v622_v25 = vsel %vm614_vm1, %v616_v13, %v600_v11  ;;  %v625_v26 = vsel %vm609_vm12, %v624_v16, %v603_v12  ;;  %vm631_vm2 = vcmp.eq.s32.totalorder %v1007_v30, 25  ;;  %vm632_vm3 = vcmp.eq.s32.totalorder %v1009_v31, 25 }
  0xa8   :  { %vm633_vm4 = vcmp.eq.s32.totalorder %v1011_v32, 25  ;;  %vm634_vm5 = vcmp.eq.s32.totalorder %v1013_v33, 25  ;;  %vm635_vm6 = vcmp.eq.s32.totalorder %v1015_v34, 25  ;;  %v638_v27 = vstv %s1854_s27 }
  0xa9   :  { %v626_v28 = vsel %vm610_vm13, %v624_v16, %v604_v14  ;;  %v627_v29 = vsel %vm611_vm14, %v624_v16, %v605_v15  ;;  %vm636_vm7 = vcmp.eq.s32.totalorder %v1017_v35, 25  ;;  %v646_v36 = vstv %s1864_s28 }
  0xaa   :  { %v628_v37 = vsel %vm612_vm15, %v624_v16, %v606_v17  ;;  %v629_v38 = vsel %vm613_vm0, %v624_v16, %v607_v18  ;;  %v630_v39 = vsel %vm614_vm1, %v624_v16, %v608_v19  ;;  %v639_v40 = vsel %vm631_vm2, %v638_v27, %v617_v20 }
  0xab   :  { %v640_v41 = vsel %vm632_vm3, %v638_v27, %v618_v21  ;;  %v641_v42 = vsel %vm633_vm4, %v638_v27, %v619_v22  ;;  %v642_v43 = vsel %vm634_vm5, %v638_v27, %v620_v23  ;;  %v643_v44 = vsel %vm635_vm6, %v638_v27, %v621_v24 }
  0xac   :  { %v644_v45 = vsel %vm636_vm7, %v638_v27, %v622_v25  ;;  %v647_v46 = vsel %vm631_vm2, %v646_v36, %v625_v26  ;;  %vm653_vm8 = vcmp.eq.s32.totalorder %v1007_v30, 26  ;;  %vm654_vm9 = vcmp.eq.s32.totalorder %v1009_v31, 26 }
  0xad   :  { %vm655_vm10 = vcmp.eq.s32.totalorder %v1011_v32, 26  ;;  %vm656_vm11 = vcmp.eq.s32.totalorder %v1013_v33, 26  ;;  %vm657_vm12 = vcmp.eq.s32.totalorder %v1015_v34, 26  ;;  %v660_v47 = vstv %s1890_s29 }
  0xae   :  { %v648_v48 = vsel %vm632_vm3, %v646_v36, %v626_v28  ;;  %v649_v49 = vsel %vm633_vm4, %v646_v36, %v627_v29  ;;  %vm658_vm13 = vcmp.eq.s32.totalorder %v1017_v35, 26  ;;  %v668_v50 = vstv %s1900_s30 }
  0xaf   :  { %v650_v51 = vsel %vm634_vm5, %v646_v36, %v628_v37  ;;  %v651_v52 = vsel %vm635_vm6, %v646_v36, %v629_v38  ;;  %v652_v53 = vsel %vm636_vm7, %v646_v36, %v630_v39  ;;  %v661_v54 = vsel %vm653_vm8, %v660_v47, %v639_v40 }
  0xb0   :  { %v662_v55 = vsel %vm654_vm9, %v660_v47, %v640_v41  ;;  %v663_v56 = vsel %vm655_vm10, %v660_v47, %v641_v42  ;;  %v664_v57 = vsel %vm656_vm11, %v660_v47, %v642_v43  ;;  %v665_v58 = vsel %vm657_vm12, %v660_v47, %v643_v44 }
  0xb1   :  { %v666_v59 = vsel %vm658_vm13, %v660_v47, %v644_v45  ;;  %v669_v60 = vsel %vm653_vm8, %v668_v50, %v647_v46  ;;  %vm675_vm14 = vcmp.eq.s32.totalorder %v1007_v30, 27  ;;  %vm676_vm15 = vcmp.eq.s32.totalorder %v1009_v31, 27 }
  0xb2   :  { %vm677_vm0 = vcmp.eq.s32.totalorder %v1011_v32, 27  ;;  %vm678_vm1 = vcmp.eq.s32.totalorder %v1013_v33, 27  ;;  %vm679_vm2 = vcmp.eq.s32.totalorder %v1015_v34, 27  ;;  %v682_v61 = vstv %s1926_s0 }
  0xb3   :  { %v670_v62 = vsel %vm654_vm9, %v668_v50, %v648_v48  ;;  %v671_v63 = vsel %vm655_vm10, %v668_v50, %v649_v49  ;;  %vm680_vm3 = vcmp.eq.s32.totalorder %v1017_v35, 27  ;;  %v690_v0 = vstv %s1936_s3 }
  0xb4   :  { %v672_v1 = vsel %vm656_vm11, %v668_v50, %v650_v51  ;;  %v673_v2 = vsel %vm657_vm12, %v668_v50, %v651_v52  ;;  %v674_v3 = vsel %vm658_vm13, %v668_v50, %v652_v53  ;;  %v683_v4 = vsel %vm675_vm14, %v682_v61, %v661_v54 }
  0xb5   :  { %v684_v5 = vsel %vm676_vm15, %v682_v61, %v662_v55  ;;  %v685_v6 = vsel %vm677_vm0, %v682_v61, %v663_v56  ;;  %v686_v7 = vsel %vm678_vm1, %v682_v61, %v664_v57  ;;  %v687_v8 = vsel %vm679_vm2, %v682_v61, %v665_v58 }
  0xb6   :  { %v688_v9 = vsel %vm680_vm3, %v682_v61, %v666_v59  ;;  %v691_v10 = vsel %vm675_vm14, %v690_v0, %v669_v60  ;;  %vm697_vm4 = vcmp.eq.s32.totalorder %v1007_v30, 28  ;;  %vm698_vm5 = vcmp.eq.s32.totalorder %v1009_v31, 28  ;;  %v889_v59 = vld [vmem:[#allocation6] sm:$0xff]  ;;  %v890_v61 = vld [vmem:[#allocation6 + $0x8] sm:$0xff] }
  0xb7   :  { %vm699_vm6 = vcmp.eq.s32.totalorder %v1011_v32, 28  ;;  %vm700_vm7 = vcmp.eq.s32.totalorder %v1013_v33, 28  ;;  %vm701_vm8 = vcmp.eq.s32.totalorder %v1015_v34, 28  ;;  %v704_v11 = vstv %s1962_s1 }
  0xb8   :  { %v692_v12 = vsel %vm676_vm15, %v690_v0, %v670_v62  ;;  %v693_v13 = vsel %vm677_vm0, %v690_v0, %v671_v63  ;;  %vm702_vm9 = vcmp.eq.s32.totalorder %v1017_v35, 28  ;;  %v712_v14 = vstv %s1972_s4  ;;  %v891_v63 = vld [vmem:[#allocation6 + $0x10] sm:$0xff] }
  0xb9   :  { %v694_v15 = vsel %vm678_vm1, %v690_v0, %v672_v1  ;;  %v695_v16 = vsel %vm679_vm2, %v690_v0, %v673_v2  ;;  %v696_v17 = vsel %vm680_vm3, %v690_v0, %v674_v3  ;;  %v705_v18 = vsel %vm697_vm4, %v704_v11, %v683_v4  ;;  %v892_v1 = vld [vmem:[#allocation6 + $0x18] sm:$0xff]  ;;  %v893_v3 = vld [vmem:[#allocation6 + $0x20] sm:$0xff]  ;;  %v894_v4 = vld [vmem:[#allocation6 + $0x28] sm:$0xff] }
  0xba   :  { %v706_v19 = vsel %vm698_vm5, %v704_v11, %v684_v5  ;;  %v707_v20 = vsel %vm699_vm6, %v704_v11, %v685_v6  ;;  %v708_v21 = vsel %vm700_vm7, %v704_v11, %v686_v7  ;;  %v709_v22 = vsel %vm701_vm8, %v704_v11, %v687_v8 }
  0xbb   :  { %v710_v23 = vsel %vm702_vm9, %v704_v11, %v688_v9  ;;  %v713_v24 = vsel %vm697_vm4, %v712_v14, %v691_v10  ;;  %vm719_vm10 = vcmp.eq.s32.totalorder %v1007_v30, 29  ;;  %vm720_vm11 = vcmp.eq.s32.totalorder %v1009_v31, 29 }
  0xbc   :  { %vm721_vm12 = vcmp.eq.s32.totalorder %v1011_v32, 29  ;;  %vm722_vm13 = vcmp.eq.s32.totalorder %v1013_v33, 29  ;;  %vm723_vm14 = vcmp.eq.s32.totalorder %v1015_v34, 29  ;;  %v726_v25 = vstv %s1998_s5 }
  0xbd   :  { %v714_v26 = vsel %vm698_vm5, %v712_v14, %v692_v12  ;;  %v715_v27 = vsel %vm699_vm6, %v712_v14, %v693_v13  ;;  %v716_v28 = vsel %vm700_vm7, %v712_v14, %v694_v15  ;;  %v717_v29 = vsel %vm701_vm8, %v712_v14, %v695_v16 }
  0xbe   :  { %v718_v36 = vsel %vm702_vm9, %v712_v14, %v696_v17  ;;  %vm724_vm15 = vcmp.eq.s32.totalorder %v1017_v35, 29  ;;  %v727_v37 = vsel %vm719_vm10, %v726_v25, %v705_v18  ;;  %v734_v38 = vstv %s2014_s6 }
  0xbf   :  { %v728_v39 = vsel %vm720_vm11, %v726_v25, %v706_v19  ;;  %v729_v40 = vsel %vm721_vm12, %v726_v25, %v707_v20  ;;  %v730_v41 = vsel %vm722_vm13, %v726_v25, %v708_v21  ;;  %v731_v42 = vsel %vm723_vm14, %v726_v25, %v709_v22 }
  0xc0   :  { %v741_v43 = vcvt.s32.f32 %v1007_v30  ;;  %v742_v44 = vcvt.s32.f32 %v1009_v31  ;;  %v743_v45 = vcvt.s32.f32 %v1011_v32  ;;  %v744_v46 = vcvt.s32.f32 %v1013_v33 }
  0xc1   :  { %v732_v47 = vsel %vm724_vm15, %v726_v25, %v710_v23  ;;  %v735_v48 = vsel %vm719_vm10, %v734_v38, %v713_v24  ;;  %v745_v49 = vcvt.s32.f32 %v1015_v34  ;;  %v746_v50 = vcvt.s32.f32 %v1017_v35 }
  0xc2   :  { %v736_v51 = vsel %vm720_vm11, %v734_v38, %v714_v26  ;;  %v747_v52 = vmul.f32 0.033333335, %v741_v43  ;;  %v748_v53 = vmul.f32 0.033333335, %v742_v44  ;;  %v749_v54 = vmul.f32 0.033333335, %v743_v45 }
  0xc3   :  { %v737_v55 = vsel %vm721_vm12, %v734_v38, %v715_v27  ;;  %v750_v56 = vmul.f32 0.033333335, %v744_v46  ;;  %v751_v57 = vmul.f32 0.033333335, %v745_v49  ;;  %v752_v58 = vmul.f32 0.033333335, %v746_v50 }
  0xc4   :  { %v738_v30 = vsel %vm722_vm13, %v734_v38, %v716_v28  ;;  %v759_v60 = vsub.f32 %v889_v59, %v747_v52  ;;  %v760_v62 = vsub.f32 %v890_v61, %v748_v53  ;;  %v761_v0 = vsub.f32 %v891_v63, %v749_v54 }
  0xc5   :  { %v739_v31 = vsel %vm723_vm14, %v734_v38, %v717_v29  ;;  %v762_v2 = vsub.f32 %v892_v1, %v750_v56  ;;  %v763_v32 = vsub.f32 %v893_v3, %v751_v57  ;;  %v764_v5 = vsub.f32 %v894_v4, %v752_v58 }
  0xc6   :  { %v740_v6 = vsel %vm724_vm15, %v734_v38, %v718_v36  ;;  %v765_v33 = vmul.f32 %v759_v60, %v727_v37  ;;  %v766_v7 = vmul.f32 %v760_v62, %v728_v39  ;;  %v767_v8 = vmul.f32 %v761_v0, %v729_v40 }
  0xc7   :  { %v768_v9 = vmul.f32 %v762_v2, %v730_v41  ;;  %v769_v10 = vmul.f32 %v763_v32, %v731_v42  ;;  %v770_v11 = vmul.f32 %v764_v5, %v732_v47 }
  0xc8   :  { %v771_v12 = vadd.f32 %v765_v33, %v735_v48  ;;  %v772_v13 = vadd.f32 %v766_v7, %v736_v51  ;;  %v773_v14 = vadd.f32 %v767_v8, %v737_v55 }
  0xc9   :  { %v774_v34 = vadd.f32 %v768_v9, %v738_v30  ;;  %v775_v15 = vadd.f32 %v769_v10, %v739_v31  ;;  %v776_v16 = vadd.f32 %v770_v11, %v740_v6 }
  0xca   :  { %v777_v17 = vmax.f32 %v771_v12, 0.0  ;;  %v778_v18 = vmax.f32 %v772_v13, 0.0  ;;  %v779_v19 = vmax.f32 %v773_v14, 0.0 }
  0xcb   :  { %v780_v20 = vmax.f32 %v774_v34, 0.0  ;;  %v781_v35 = vmax.f32 %v775_v15, 0.0  ;;  %v782_v21 = vmax.f32 %v776_v16, 0.0 }
  0xcc   :  { %v783_v22 = vmin.f32 %v777_v17, 1.0  ;;  %v784_v23 = vmin.f32 %v778_v18, 1.0  ;;  %v785_v24 = vmin.f32 %v779_v19, 1.0 }
  0xcd   :  { %v786_v25 = vmin.f32 %v780_v20, 1.0  ;;  %v787_v26 = vmin.f32 %v781_v35, 1.0  ;;  %v788_v27 = vmin.f32 %v782_v21, 1.0 }
  0xce   :  { %789 = vst [vmem:[#allocation7] sm:$0xff] %v783_v22  ;;  %790 = vst [vmem:[#allocation7 + $0x8] sm:$0xff] %v784_v23 }
  0xcf   :  { %791 = vst [vmem:[#allocation7 + $0x10] sm:$0xff] %v785_v24  ;;  %792 = vst [vmem:[#allocation7 + $0x18] sm:$0xff] %v786_v25 }
  0xd0   :  { %793 = vst [vmem:[#allocation7 + $0x20] sm:$0xff] %v787_v26  ;;  %794 = vst [vmem:[#allocation7 + $0x28] sm:$0xff] %v788_v27 }
  0xd1   :  { %938 = shalt.err (!%p935_p1)
}
  0xd2   :  { %s939_s12 = scalar_lea.hbm %s2111_s2, 768 }
  0xd3   :  { %p940_p2 = scmp.ne.s32.totalorder %s2111_s2, %s939_s12  ;;  %p943_p3 = scmp.lt.u32.totalorder %s939_s12, %s2111_s2 }
  0xd5   :  { %p945_p4 = pnand %p943_p3, %p940_p2 }
  0xd7   :  { %948 = shalt.err (!%p945_p4)
}
  0xd8   :  { %806 = dma.vmem_to_hbm [thread:$0]  %s801_s8, 768, %s2111_s2, [#allocation4], %s956_s17, %s956_s17, %s957_s18  }
  0xd9   :  { %953 = dma.done.wait [#allocation4], 768  }
  0xda   :  { %954 = vsyncadd [#allocation4], 4294966528 }
  0xdb   :  { %810 = vsyncpa [#allocation3], 1 }
  0xdc   :  { %811 = vsyncpa [#allocation4], 1 }
  0xdd   :  { %812 = vsyncpa [#allocation5], 1 }

</bundles_post_ra>
